<compile_context>
chip_gen: v5e
topology: v5e:2x2
jax: 0.10.0
libtpu: 0.0.40
codegen_flags: <defaults>
</compile_context>

<pallas_src>
import functools

import jax
import jax.numpy as jnp
from jax.experimental import pallas as pl
from jax.experimental.pallas import tpu as pltpu

N_ACT = 10
N_ID = 9
_VMEM_LIMIT = 32 * 1024 * 1024  # safe scoped-VMEM budget on v5e / v6e / v7x


# ----------------------------------------------------------------------------
# Conv 3x3 / stride 2 / pad 1 + bias + ReLU (+ optional fused global-avg-pool)
# One batch element per grid step.
# ----------------------------------------------------------------------------
def _conv3x3s2_kernel(x00_ref, x01_ref, x10_ref, x11_ref, w_ref, b_ref, o_ref,
                      *, oh, ow, pool, inv_p):
    """Inputs are the 4 stride-2 phase planes of the padded image, so every
    in-kernel slice is unit-stride.  9 taps -> 9 bf16 MXU matmuls, f32 acc."""
    cin = x00_ref.shape[-1]
    cout = w_ref.shape[-1]
    phases = ((x00_ref[...], x01_ref[...]),
              (x10_ref[...], x11_ref[...]))                 # each (oh+1, ow+1, cin)
    acc = jnp.zeros((oh * ow, cout), jnp.float32)
    for di in range(3):
        for dj in range(3):
            xp = phases[di % 2][dj % 2]
            r0, c0 = di // 2, dj // 2
            xs = xp[r0:r0 + oh, c0:c0 + ow, :]              # (oh, ow, cin)
            xs = xs.reshape(oh * ow, cin).astype(jnp.bfloat16)
            acc = acc + jnp.dot(xs, w_ref[di * 3 + dj],
                                preferred_element_type=jnp.float32)
    out = jnp.maximum(acc + b_ref[...], 0.0)                # bias + ReLU (f32)
    if pool:
        # fused GAP: only (1, cout) leaves the kernel
        o_ref[...] = (jnp.sum(out, axis=0, keepdims=True) * inv_p).astype(o_ref.dtype)
    else:
        o_ref[...] = out.astype(o_ref.dtype)


def _phase_split(x, oh, ow):
    # x: (B, H, W, C) NHWC.  Pad 1 on top/left, 2 on bottom/right so every phase
    # plane has >= oh+1 / ow+1 rows/cols; then slice to exactly that size.
    xp = jnp.pad(x, ((0, 0), (1, 2), (1, 2), (0, 0)))
    return [xp[:, p::2, q::2, :][:, :oh + 1, :ow + 1, :]
            for p in (0, 1) for q in (0, 1)]


def conv3x3_s2_relu(x, w, b, *, pool=False, out_dtype=jnp.bfloat16):
    """NHWC 3x3 stride-2 pad-1 conv + ReLU.  x: (B,H,W,Cin), w: (3,3,Cin,Cout).
    Returns (B, oh, ow, Cout) activations, or (B, Cout) if pool=True (fused GAP)."""
    B, H, W, cin = x.shape
    cout = w.shape[-1]
    oh = (H - 1) // 2 + 1
    ow = (W - 1) // 2 + 1
    phases = _phase_split(x, oh, ow)
    w9 = w.reshape(9, cin, cout).astype(jnp.bfloat16)       # bf16 MXU operand
    b2 = b.reshape(1, cout).astype(jnp.float32)

    phase_spec = pl.BlockSpec((None, oh + 1, ow + 1, cin), lambda i: (i, 0, 0, 0))
    if pool:
        out_shape = jax.ShapeDtypeStruct((B, 1, cout), jnp.float32)
        out_spec = pl.BlockSpec((None, 1, cout), lambda i: (i, 0, 0))
    else:
        out_shape = jax.ShapeDtypeStruct((B, oh * ow, cout), out_dtype)
        out_spec = pl.BlockSpec((None, oh * ow, cout), lambda i: (i, 0, 0))

    out = pl.pallas_call(
        functools.partial(_conv3x3s2_kernel, oh=oh, ow=ow, pool=pool,
                          inv_p=1.0 / float(oh * ow)),
        out_shape=out_shape,
        grid=(B,),
        in_specs=[phase_spec, phase_spec, phase_spec, phase_spec,
                  pl.BlockSpec((9, cin, cout), lambda i: (0, 0, 0)),
                  pl.BlockSpec((1, cout), lambda i: (0, 0))],
        out_specs=out_spec,
        compiler_params=pltpu.CompilerParams(
            dimension_semantics=("parallel",),               # 2-TC split on v7x
            vmem_limit_bytes=_VMEM_LIMIT),
    )(*phases, w9, b2)
    # TODO(synk): for very large spatial dims add an output-row grid axis so a
    # single image block need not fit VMEM.
    if pool:
        return out.reshape(B, cout)
    return out.reshape(B, oh, ow, cout)


# ----------------------------------------------------------------------------
# Fused tail: enc_fc -> fc1 + ReLU -> combined (act|id) head
# ----------------------------------------------------------------------------
def _tail_kernel(z0_ref, ew_ref, eb_ref, f1w_ref, f1b_ref, hw_ref, hb_ref, o_ref):
    z = jnp.dot(z0_ref[...].astype(jnp.bfloat16), ew_ref[...],
                preferred_element_type=jnp.float32) + eb_ref[...]          # enc fc
    hid = jnp.dot(z.astype(jnp.bfloat16), f1w_ref[...],
                  preferred_element_type=jnp.float32) + f1b_ref[...]
    hid = jnp.maximum(hid, 0.0)                                            # fc1+ReLU
    out = jnp.dot(hid.astype(jnp.bfloat16), hw_ref[...],
                  preferred_element_type=jnp.float32) + hb_ref[...]        # heads
    o_ref[...] = out.astype(o_ref.dtype)


def attribute_tail(z0, params):
    """z0: (B, C) pooled conv features -> (B, n_head_padded) logits, one kernel."""
    B, C = z0.shape
    ew = params["enc_fc_w"].astype(jnp.bfloat16)
    f1w = params["fc1_w"].astype(jnp.bfloat16)
    hw = params["head_w"].astype(jnp.bfloat16)
    eb = params["enc_fc_b"].reshape(1, -1)
    f1b = params["fc1_b"].reshape(1, -1)
    hb = params["head_b"].reshape(1, -1)
    z_dim, h_dim, n_head = ew.shape[1], f1w.shape[1], hw.shape[1]

    return pl.pallas_call(
        _tail_kernel,
        out_shape=jax.ShapeDtypeStruct((B, n_head), jnp.float32),
        grid=(1,),
        in_specs=[
            pl.BlockSpec((B, C), lambda i: (0, 0)),
            pl.BlockSpec((C, z_dim), lambda i: (0, 0)),
            pl.BlockSpec((1, z_dim), lambda i: (0, 0)),
            pl.BlockSpec((z_dim, h_dim), lambda i: (0, 0)),
            pl.BlockSpec((1, h_dim), lambda i: (0, 0)),
            pl.BlockSpec((h_dim, n_head), lambda i: (0, 0)),
            pl.BlockSpec((1, n_head), lambda i: (0, 0)),
        ],
        out_specs=pl.BlockSpec((B, n_head), lambda i: (0, 0)),
        compiler_params=pltpu.CompilerParams(vmem_limit_bytes=_VMEM_LIMIT),
    )(z0, ew, eb, f1w, f1b, hw, hb)


# ----------------------------------------------------------------------------
# Parameters (deterministic synthetic init) and forward pass
# ----------------------------------------------------------------------------
def init_params(key, in_c=3, z_dim=512, h_dim=128, n_act=N_ACT, n_id=N_ID,
                c1=64, c2=128):
    # Channel widths chosen lane-friendly (64 / 128) since Encoder internals
    # are assumed anyway.
    ks = jax.random.split(key, 6)

    def lin(k, fan_in, shape):
        return jax.random.normal(k, shape, jnp.float32) / jnp.sqrt(float(fan_in))

    act_w = lin(ks[4], h_dim, (h_dim, n_act))
    id_w = lin(ks[5], h_dim, (h_dim, n_id))
    n_head = max(128, -(-(n_act + n_id) // 128) * 128)      # pad heads lane-dense
    head_w = jnp.zeros((h_dim, n_head), jnp.float32)
    head_w = head_w.at[:, :n_act].set(act_w).at[:, n_act:n_act + n_id].set(id_w)
    head_b = jnp.zeros((n_head,), jnp.float32)

    return {
        "conv1_w": lin(ks[0], 3 * 3 * in_c, (3, 3, in_c, c1)),
        "conv1_b": jnp.zeros((c1,), jnp.float32),
        "conv2_w": lin(ks[1], 3 * 3 * c1, (3, 3, c1, c2)),
        "conv2_b": jnp.zeros((c2,), jnp.float32),
        "enc_fc_w": lin(ks[2], c2, (c2, z_dim)),
        "enc_fc_b": jnp.zeros((z_dim,), jnp.float32),
        "fc1_w": lin(ks[3], z_dim, (z_dim, h_dim)),
        "fc1_b": jnp.zeros((h_dim,), jnp.float32),
        "head_w": head_w,
        "head_b": head_b,
    }


@jax.jit
def classifier_forward(params, x_nchw):
    # layout: PyTorch NCHW -> NHWC for the kernels.
    x = jnp.transpose(x_nchw, (0, 2, 3, 1)).astype(jnp.float32)

    # Encoder conv stack (bf16 intermediate; GAP fused into the second conv).
    h = conv3x3_s2_relu(x, params["conv1_w"], params["conv1_b"])            # (B,8,8,64)
    z0 = conv3x3_s2_relu(h, params["conv2_w"], params["conv2_b"], pool=True)  # (B,128)

    # Fused enc_fc + AttributeNet (single pallas_call, lane-dense head).
    logits = attribute_tail(z0, params)
    return logits[:, :N_ACT], logits[:, N_ACT:N_ACT + N_ID]


if __name__ == "__main__":
    key = jax.random.PRNGKey(0)
    k_x, k_p = jax.random.split(key)

    batch, in_c, spatial = 2, 3, 16
    x = jax.random.normal(k_x, (batch, in_c, spatial, spatial), jnp.float32)
    params = init_params(k_p, in_c=in_c, z_dim=512, h_dim=128,
                         n_act=N_ACT, n_id=N_ID)

    out_act, out_id = classifier_forward(params, x)
    jax.block_until_ready((out_act, out_id))

    assert out_act.shape == (batch, N_ACT) and out_id.shape == (batch, N_ID)
    assert bool(jnp.all(jnp.isfinite(out_act))) and bool(jnp.all(jnp.isfinite(out_id)))
    print("KERNEL_OK")
</pallas_src>

<mosaic_0001>
module attributes {stable_mosaic.version = 11 : i64} {
  func.func @_conv3x3s2_kernel(%arg0: i32, %arg1: memref<1x9x9x3xf32, #tpu.memory_space<vmem>>, %arg2: memref<1x9x9x3xf32, #tpu.memory_space<vmem>>, %arg3: memref<1x9x9x3xf32, #tpu.memory_space<vmem>>, %arg4: memref<1x9x9x3xf32, #tpu.memory_space<vmem>>, %arg5: memref<9x3x64xbf16, #tpu.memory_space<vmem>>, %arg6: memref<1x64xf32, #tpu.memory_space<vmem>>, %arg7: memref<1x64x64xbf16, #tpu.memory_space<vmem>>) attributes {dimension_semantics = [#tpu.dimension_semantics<parallel>], iteration_bounds = array<i64: 2>, scalar_prefetch = 0 : i64, scratch_operands = 0 : i64, tpu.core_type = #tpu.core_type<tc>, window_params = [{transform_indices = @transform_0, window_bounds = array<i64: 1, 9, 9, 3>}, {transform_indices = @transform_1, window_bounds = array<i64: 1, 9, 9, 3>}, {transform_indices = @transform_2, window_bounds = array<i64: 1, 9, 9, 3>}, {transform_indices = @transform_3, window_bounds = array<i64: 1, 9, 9, 3>}, {pipeline_mode = #tpu.pipeline_mode<synchronous>, transform_indices = @transform_4, window_bounds = array<i64: 9, 3, 64>}, {pipeline_mode = #tpu.pipeline_mode<synchronous>, transform_indices = @transform_5, window_bounds = array<i64: 1, 64>}, {transform_indices = @transform_6, window_bounds = array<i64: 1, 64, 64>}]} {
    %c0 = arith.constant 0 : index
    %c0_0 = arith.constant 0 : index
    %c0_1 = arith.constant 0 : index
    %c0_2 = arith.constant 0 : index
    %0 = vector.load %arg1[%c0, %c0_0, %c0_1, %c0_2] : memref<1x9x9x3xf32, #tpu.memory_space<vmem>>, vector<1x9x9x3xf32>
    %1 = vector.shape_cast %0 : vector<1x9x9x3xf32> to vector<9x9x3xf32>
    %c0_3 = arith.constant 0 : index
    %c0_4 = arith.constant 0 : index
    %c0_5 = arith.constant 0 : index
    %c0_6 = arith.constant 0 : index
    %2 = vector.load %arg2[%c0_3, %c0_4, %c0_5, %c0_6] : memref<1x9x9x3xf32, #tpu.memory_space<vmem>>, vector<1x9x9x3xf32>
    %3 = vector.shape_cast %2 : vector<1x9x9x3xf32> to vector<9x9x3xf32>
    %c0_7 = arith.constant 0 : index
    %c0_8 = arith.constant 0 : index
    %c0_9 = arith.constant 0 : index
    %c0_10 = arith.constant 0 : index
    %4 = vector.load %arg3[%c0_7, %c0_8, %c0_9, %c0_10] : memref<1x9x9x3xf32, #tpu.memory_space<vmem>>, vector<1x9x9x3xf32>
    %5 = vector.shape_cast %4 : vector<1x9x9x3xf32> to vector<9x9x3xf32>
    %c0_11 = arith.constant 0 : index
    %c0_12 = arith.constant 0 : index
    %c0_13 = arith.constant 0 : index
    %c0_14 = arith.constant 0 : index
    %6 = vector.load %arg4[%c0_11, %c0_12, %c0_13, %c0_14] : memref<1x9x9x3xf32, #tpu.memory_space<vmem>>, vector<1x9x9x3xf32>
    %7 = vector.shape_cast %6 : vector<1x9x9x3xf32> to vector<9x9x3xf32>
    %cst = arith.constant 0.000000e+00 : f32
    %8 = vector.broadcast %cst : f32 to vector<64x64xf32>
    %9 = vector.extract_strided_slice %1 {offsets = [0, 0, 0], sizes = [8, 8, 3], strides = [1, 1, 1]} : vector<9x9x3xf32> to vector<8x8x3xf32>
    %10 = vector.shape_cast %9 : vector<8x8x3xf32> to vector<64x3xf32>
    %11 = arith.truncf %10 : vector<64x3xf32> to vector<64x3xbf16>
    %c0_15 = arith.constant 0 : index
    %c0_16 = arith.constant 0 : index
    %c0_17 = arith.constant 0 : index
    %12 = vector.load %arg5[%c0_15, %c0_16, %c0_17] : memref<9x3x64xbf16, #tpu.memory_space<vmem>>, vector<1x3x64xbf16>
    %13 = vector.shape_cast %12 : vector<1x3x64xbf16> to vector<3x64xbf16>
    %cst_18 = arith.constant dense<0.000000e+00> : vector<64x64xf32>
    %14 = tpu.matmul %11, %13, %cst_18 {dimension_numbers = #tpu.dot_dimension_numbers<[1], [0], [0], [1], [0, 0, 1, 1], [], []>} : vector<64x3xbf16>, vector<3x64xbf16>, vector<64x64xf32> -> vector<64x64xf32>
    %15 = arith.addf %8, %14 : vector<64x64xf32>
    %16 = vector.extract_strided_slice %3 {offsets = [0, 0, 0], sizes = [8, 8, 3], strides = [1, 1, 1]} : vector<9x9x3xf32> to vector<8x8x3xf32>
    %17 = vector.shape_cast %16 : vector<8x8x3xf32> to vector<64x3xf32>
    %18 = arith.truncf %17 : vector<64x3xf32> to vector<64x3xbf16>
    %c1 = arith.constant 1 : index
    %c0_19 = arith.constant 0 : index
    %c0_20 = arith.constant 0 : index
    %19 = vector.load %arg5[%c1, %c0_19, %c0_20] : memref<9x3x64xbf16, #tpu.memory_space<vmem>>, vector<1x3x64xbf16>
    %20 = vector.shape_cast %19 : vector<1x3x64xbf16> to vector<3x64xbf16>
    %cst_21 = arith.constant dense<0.000000e+00> : vector<64x64xf32>
    %21 = tpu.matmul %18, %20, %cst_21 {dimension_numbers = #tpu.dot_dimension_numbers<[1], [0], [0], [1], [0, 0, 1, 1], [], []>} : vector<64x3xbf16>, vector<3x64xbf16>, vector<64x64xf32> -> vector<64x64xf32>
    %22 = arith.addf %15, %21 : vector<64x64xf32>
    %23 = vector.extract_strided_slice %1 {offsets = [0, 1, 0], sizes = [8, 8, 3], strides = [1, 1, 1]} : vector<9x9x3xf32> to vector<8x8x3xf32>
    %24 = vector.shape_cast %23 : vector<8x8x3xf32> to vector<64x3xf32>
    %25 = arith.truncf %24 : vector<64x3xf32> to vector<64x3xbf16>
    %c2 = arith.constant 2 : index
    %c0_22 = arith.constant 0 : index
    %c0_23 = arith.constant 0 : index
    %26 = vector.load %arg5[%c2, %c0_22, %c0_23] : memref<9x3x64xbf16, #tpu.memory_space<vmem>>, vector<1x3x64xbf16>
    %27 = vector.shape_cast %26 : vector<1x3x64xbf16> to vector<3x64xbf16>
    %cst_24 = arith.constant dense<0.000000e+00> : vector<64x64xf32>
    %28 = tpu.matmul %25, %27, %cst_24 {dimension_numbers = #tpu.dot_dimension_numbers<[1], [0], [0], [1], [0, 0, 1, 1], [], []>} : vector<64x3xbf16>, vector<3x64xbf16>, vector<64x64xf32> -> vector<64x64xf32>
    %29 = arith.addf %22, %28 : vector<64x64xf32>
    %30 = vector.extract_strided_slice %5 {offsets = [0, 0, 0], sizes = [8, 8, 3], strides = [1, 1, 1]} : vector<9x9x3xf32> to vector<8x8x3xf32>
    %31 = vector.shape_cast %30 : vector<8x8x3xf32> to vector<64x3xf32>
    %32 = arith.truncf %31 : vector<64x3xf32> to vector<64x3xbf16>
    %c3 = arith.constant 3 : index
    %c0_25 = arith.constant 0 : index
    %c0_26 = arith.constant 0 : index
    %33 = vector.load %arg5[%c3, %c0_25, %c0_26] : memref<9x3x64xbf16, #tpu.memory_space<vmem>>, vector<1x3x64xbf16>
    %34 = vector.shape_cast %33 : vector<1x3x64xbf16> to vector<3x64xbf16>
    %cst_27 = arith.constant dense<0.000000e+00> : vector<64x64xf32>
    %35 = tpu.matmul %32, %34, %cst_27 {dimension_numbers = #tpu.dot_dimension_numbers<[1], [0], [0], [1], [0, 0, 1, 1], [], []>} : vector<64x3xbf16>, vector<3x64xbf16>, vector<64x64xf32> -> vector<64x64xf32>
    %36 = arith.addf %29, %35 : vector<64x64xf32>
    %37 = vector.extract_strided_slice %7 {offsets = [0, 0, 0], sizes = [8, 8, 3], strides = [1, 1, 1]} : vector<9x9x3xf32> to vector<8x8x3xf32>
    %38 = vector.shape_cast %37 : vector<8x8x3xf32> to vector<64x3xf32>
    %39 = arith.truncf %38 : vector<64x3xf32> to vector<64x3xbf16>
    %c4 = arith.constant 4 : index
    %c0_28 = arith.constant 0 : index
    %c0_29 = arith.constant 0 : index
    %40 = vector.load %arg5[%c4, %c0_28, %c0_29] : memref<9x3x64xbf16, #tpu.memory_space<vmem>>, vector<1x3x64xbf16>
    %41 = vector.shape_cast %40 : vector<1x3x64xbf16> to vector<3x64xbf16>
    %cst_30 = arith.constant dense<0.000000e+00> : vector<64x64xf32>
    %42 = tpu.matmul %39, %41, %cst_30 {dimension_numbers = #tpu.dot_dimension_numbers<[1], [0], [0], [1], [0, 0, 1, 1], [], []>} : vector<64x3xbf16>, vector<3x64xbf16>, vector<64x64xf32> -> vector<64x64xf32>
    %43 = arith.addf %36, %42 : vector<64x64xf32>
    %44 = vector.extract_strided_slice %5 {offsets = [0, 1, 0], sizes = [8, 8, 3], strides = [1, 1, 1]} : vector<9x9x3xf32> to vector<8x8x3xf32>
    %45 = vector.shape_cast %44 : vector<8x8x3xf32> to vector<64x3xf32>
    %46 = arith.truncf %45 : vector<64x3xf32> to vector<64x3xbf16>
    %c5 = arith.constant 5 : index
    %c0_31 = arith.constant 0 : index
    %c0_32 = arith.constant 0 : index
    %47 = vector.load %arg5[%c5, %c0_31, %c0_32] : memref<9x3x64xbf16, #tpu.memory_space<vmem>>, vector<1x3x64xbf16>
    %48 = vector.shape_cast %47 : vector<1x3x64xbf16> to vector<3x64xbf16>
    %cst_33 = arith.constant dense<0.000000e+00> : vector<64x64xf32>
    %49 = tpu.matmul %46, %48, %cst_33 {dimension_numbers = #tpu.dot_dimension_numbers<[1], [0], [0], [1], [0, 0, 1, 1], [], []>} : vector<64x3xbf16>, vector<3x64xbf16>, vector<64x64xf32> -> vector<64x64xf32>
    %50 = arith.addf %43, %49 : vector<64x64xf32>
    %51 = vector.extract_strided_slice %1 {offsets = [1, 0, 0], sizes = [8, 8, 3], strides = [1, 1, 1]} : vector<9x9x3xf32> to vector<8x8x3xf32>
    %52 = vector.shape_cast %51 : vector<8x8x3xf32> to vector<64x3xf32>
    %53 = arith.truncf %52 : vector<64x3xf32> to vector<64x3xbf16>
    %c6 = arith.constant 6 : index
    %c0_34 = arith.constant 0 : index
    %c0_35 = arith.constant 0 : index
    %54 = vector.load %arg5[%c6, %c0_34, %c0_35] : memref<9x3x64xbf16, #tpu.memory_space<vmem>>, vector<1x3x64xbf16>
    %55 = vector.shape_cast %54 : vector<1x3x64xbf16> to vector<3x64xbf16>
    %cst_36 = arith.constant dense<0.000000e+00> : vector<64x64xf32>
    %56 = tpu.matmul %53, %55, %cst_36 {dimension_numbers = #tpu.dot_dimension_numbers<[1], [0], [0], [1], [0, 0, 1, 1], [], []>} : vector<64x3xbf16>, vector<3x64xbf16>, vector<64x64xf32> -> vector<64x64xf32>
    %57 = arith.addf %50, %56 : vector<64x64xf32>
    %58 = vector.extract_strided_slice %3 {offsets = [1, 0, 0], sizes = [8, 8, 3], strides = [1, 1, 1]} : vector<9x9x3xf32> to vector<8x8x3xf32>
    %59 = vector.shape_cast %58 : vector<8x8x3xf32> to vector<64x3xf32>
    %60 = arith.truncf %59 : vector<64x3xf32> to vector<64x3xbf16>
    %c7 = arith.constant 7 : index
    %c0_37 = arith.constant 0 : index
    %c0_38 = arith.constant 0 : index
    %61 = vector.load %arg5[%c7, %c0_37, %c0_38] : memref<9x3x64xbf16, #tpu.memory_space<vmem>>, vector<1x3x64xbf16>
    %62 = vector.shape_cast %61 : vector<1x3x64xbf16> to vector<3x64xbf16>
    %cst_39 = arith.constant dense<0.000000e+00> : vector<64x64xf32>
    %63 = tpu.matmul %60, %62, %cst_39 {dimension_numbers = #tpu.dot_dimension_numbers<[1], [0], [0], [1], [0, 0, 1, 1], [], []>} : vector<64x3xbf16>, vector<3x64xbf16>, vector<64x64xf32> -> vector<64x64xf32>
    %64 = arith.addf %57, %63 : vector<64x64xf32>
    %65 = vector.extract_strided_slice %1 {offsets = [1, 1, 0], sizes = [8, 8, 3], strides = [1, 1, 1]} : vector<9x9x3xf32> to vector<8x8x3xf32>
    %66 = vector.shape_cast %65 : vector<8x8x3xf32> to vector<64x3xf32>
    %67 = arith.truncf %66 : vector<64x3xf32> to vector<64x3xbf16>
    %c8 = arith.constant 8 : index
    %c0_40 = arith.constant 0 : index
    %c0_41 = arith.constant 0 : index
    %68 = vector.load %arg5[%c8, %c0_40, %c0_41] : memref<9x3x64xbf16, #tpu.memory_space<vmem>>, vector<1x3x64xbf16>
    %69 = vector.shape_cast %68 : vector<1x3x64xbf16> to vector<3x64xbf16>
    %cst_42 = arith.constant dense<0.000000e+00> : vector<64x64xf32>
    %70 = tpu.matmul %67, %69, %cst_42 {dimension_numbers = #tpu.dot_dimension_numbers<[1], [0], [0], [1], [0, 0, 1, 1], [], []>} : vector<64x3xbf16>, vector<3x64xbf16>, vector<64x64xf32> -> vector<64x64xf32>
    %71 = arith.addf %64, %70 : vector<64x64xf32>
    %c0_43 = arith.constant 0 : index
    %c0_44 = arith.constant 0 : index
    %72 = vector.load %arg6[%c0_43, %c0_44] : memref<1x64xf32, #tpu.memory_space<vmem>>, vector<1x64xf32>
    %73 = vector.broadcast %72 : vector<1x64xf32> to vector<64x64xf32>
    %74 = arith.addf %71, %73 : vector<64x64xf32>
    %cst_45 = arith.constant 0.000000e+00 : f32
    %75 = vector.broadcast %cst_45 : f32 to vector<64x64xf32>
    %76 = arith.maximumf %74, %75 : vector<64x64xf32>
    %77 = arith.truncf %76 : vector<64x64xf32> to vector<64x64xbf16>
    %c0_46 = arith.constant 0 : index
    %c0_47 = arith.constant 0 : index
    %c0_48 = arith.constant 0 : index
    %78 = vector.load %arg7[%c0_46, %c0_47, %c0_48] : memref<1x64x64xbf16, #tpu.memory_space<vmem>>, vector<1x64x64xbf16>
    %79 = vector.shape_cast %78 : vector<1x64x64xbf16> to vector<64x64xbf16>
    %80 = vector.shape_cast %77 : vector<64x64xbf16> to vector<1x64x64xbf16>
    tpu.vector_store %arg7[%c0_46, %c0_47, %c0_48], %80 {strides = array<i32>} : memref<1x64x64xbf16, #tpu.memory_space<vmem>>, vector<1x64x64xbf16>,
    return
  }
  func.func @transform_0(%arg0: i32) -> (i32, i32, i32, i32) {
    %c0_i32 = arith.constant 0 : i32
    %c0_i32_0 = arith.constant 0 : i32
    %c0_i32_1 = arith.constant 0 : i32
    %c0_i32_2 = arith.constant 0 : i32
    return %arg0, %c0_i32, %c0_i32_0, %c0_i32_1 : i32, i32, i32, i32
  }
  func.func @transform_1(%arg0: i32) -> (i32, i32, i32, i32) {
    %c0_i32 = arith.constant 0 : i32
    %c0_i32_0 = arith.constant 0 : i32
    %c0_i32_1 = arith.constant 0 : i32
    %c0_i32_2 = arith.constant 0 : i32
    return %arg0, %c0_i32, %c0_i32_0, %c0_i32_1 : i32, i32, i32, i32
  }
  func.func @transform_2(%arg0: i32) -> (i32, i32, i32, i32) {
    %c0_i32 = arith.constant 0 : i32
    %c0_i32_0 = arith.constant 0 : i32
    %c0_i32_1 = arith.constant 0 : i32
    %c0_i32_2 = arith.constant 0 : i32
    return %arg0, %c0_i32, %c0_i32_0, %c0_i32_1 : i32, i32, i32, i32
  }
  func.func @transform_3(%arg0: i32) -> (i32, i32, i32, i32) {
    %c0_i32 = arith.constant 0 : i32
    %c0_i32_0 = arith.constant 0 : i32
    %c0_i32_1 = arith.constant 0 : i32
    %c0_i32_2 = arith.constant 0 : i32
    return %arg0, %c0_i32, %c0_i32_0, %c0_i32_1 : i32, i32, i32, i32
  }
  func.func @transform_4(%arg0: i32) -> (i32, i32, i32) {
    %c0_i32 = arith.constant 0 : i32
    %c0_i32_0 = arith.constant 0 : i32
    %c0_i32_1 = arith.constant 0 : i32
    %c0_i32_2 = arith.constant 0 : i32
    return %c0_i32, %c0_i32_0, %c0_i32_1 : i32, i32, i32
  }
  func.func @transform_5(%arg0: i32) -> (i32, i32) {
    %c0_i32 = arith.constant 0 : i32
    %c0_i32_0 = arith.constant 0 : i32
    %c0_i32_1 = arith.constant 0 : i32
    return %c0_i32, %c0_i32_0 : i32, i32
  }
  func.func @transform_6(%arg0: i32) -> (i32, i32, i32) {
    %c0_i32 = arith.constant 0 : i32
    %c0_i32_0 = arith.constant 0 : i32
    %c0_i32_1 = arith.constant 0 : i32
    return %arg0, %c0_i32, %c0_i32_0 : i32, i32, i32
  }
}

module attributes {stable_mosaic.version = 11 : i64} {
  func.func @_conv3x3s2_kernel(%arg0: i32, %arg1: memref<1x5x5x64xbf16, #tpu.memory_space<vmem>>, %arg2: memref<1x5x5x64xbf16, #tpu.memory_space<vmem>>, %arg3: memref<1x5x5x64xbf16, #tpu.memory_space<vmem>>, %arg4: memref<1x5x5x64xbf16, #tpu.memory_space<vmem>>, %arg5: memref<9x64x128xbf16, #tpu.memory_space<vmem>>, %arg6: memref<1x128xf32, #tpu.memory_space<vmem>>, %arg7: memref<1x1x128xf32, #tpu.memory_space<vmem>>) attributes {dimension_semantics = [#tpu.dimension_semantics<parallel>], iteration_bounds = array<i64: 2>, scalar_prefetch = 0 : i64, scratch_operands = 0 : i64, tpu.core_type = #tpu.core_type<tc>, window_params = [{transform_indices = @transform_0, window_bounds = array<i64: 1, 5, 5, 64>}, {transform_indices = @transform_1, window_bounds = array<i64: 1, 5, 5, 64>}, {transform_indices = @transform_2, window_bounds = array<i64: 1, 5, 5, 64>}, {transform_indices = @transform_3, window_bounds = array<i64: 1, 5, 5, 64>}, {pipeline_mode = #tpu.pipeline_mode<synchronous>, transform_indices = @transform_4, window_bounds = array<i64: 9, 64, 128>}, {pipeline_mode = #tpu.pipeline_mode<synchronous>, transform_indices = @transform_5, window_bounds = array<i64: 1, 128>}, {transform_indices = @transform_6, window_bounds = array<i64: 1, 1, 128>}]} {
    %c0 = arith.constant 0 : index
    %c0_0 = arith.constant 0 : index
    %c0_1 = arith.constant 0 : index
    %c0_2 = arith.constant 0 : index
    %0 = vector.load %arg1[%c0, %c0_0, %c0_1, %c0_2] : memref<1x5x5x64xbf16, #tpu.memory_space<vmem>>, vector<1x5x5x64xbf16>
    %1 = vector.shape_cast %0 : vector<1x5x5x64xbf16> to vector<5x5x64xbf16>
    %c0_3 = arith.constant 0 : index
    %c0_4 = arith.constant 0 : index
    %c0_5 = arith.constant 0 : index
    %c0_6 = arith.constant 0 : index
    %2 = vector.load %arg2[%c0_3, %c0_4, %c0_5, %c0_6] : memref<1x5x5x64xbf16, #tpu.memory_space<vmem>>, vector<1x5x5x64xbf16>
    %3 = vector.shape_cast %2 : vector<1x5x5x64xbf16> to vector<5x5x64xbf16>
    %c0_7 = arith.constant 0 : index
    %c0_8 = arith.constant 0 : index
    %c0_9 = arith.constant 0 : index
    %c0_10 = arith.constant 0 : index
    %4 = vector.load %arg3[%c0_7, %c0_8, %c0_9, %c0_10] : memref<1x5x5x64xbf16, #tpu.memory_space<vmem>>, vector<1x5x5x64xbf16>
    %5 = vector.shape_cast %4 : vector<1x5x5x64xbf16> to vector<5x5x64xbf16>
    %c0_11 = arith.constant 0 : index
    %c0_12 = arith.constant 0 : index
    %c0_13 = arith.constant 0 : index
    %c0_14 = arith.constant 0 : index
    %6 = vector.load %arg4[%c0_11, %c0_12, %c0_13, %c0_14] : memref<1x5x5x64xbf16, #tpu.memory_space<vmem>>, vector<1x5x5x64xbf16>
    %7 = vector.shape_cast %6 : vector<1x5x5x64xbf16> to vector<5x5x64xbf16>
    %cst = arith.constant 0.000000e+00 : f32
    %8 = vector.broadcast %cst : f32 to vector<16x128xf32>
    %9 = vector.extract_strided_slice %1 {offsets = [0, 0, 0], sizes = [4, 4, 64], strides = [1, 1, 1]} : vector<5x5x64xbf16> to vector<4x4x64xbf16>
    %10 = vector.shape_cast %9 : vector<4x4x64xbf16> to vector<16x64xbf16>
    %c0_15 = arith.constant 0 : index
    %c0_16 = arith.constant 0 : index
    %c0_17 = arith.constant 0 : index
    %11 = vector.load %arg5[%c0_15, %c0_16, %c0_17] : memref<9x64x128xbf16, #tpu.memory_space<vmem>>, vector<1x64x128xbf16>
    %12 = vector.shape_cast %11 : vector<1x64x128xbf16> to vector<64x128xbf16>
    %cst_18 = arith.constant dense<0.000000e+00> : vector<16x128xf32>
    %13 = tpu.matmul %10, %12, %cst_18 {dimension_numbers = #tpu.dot_dimension_numbers<[1], [0], [0], [1], [0, 0, 1, 1], [], []>} : vector<16x64xbf16>, vector<64x128xbf16>, vector<16x128xf32> -> vector<16x128xf32>
    %14 = arith.addf %8, %13 : vector<16x128xf32>
    %15 = vector.extract_strided_slice %3 {offsets = [0, 0, 0], sizes = [4, 4, 64], strides = [1, 1, 1]} : vector<5x5x64xbf16> to vector<4x4x64xbf16>
    %16 = vector.shape_cast %15 : vector<4x4x64xbf16> to vector<16x64xbf16>
    %c1 = arith.constant 1 : index
    %c0_19 = arith.constant 0 : index
    %c0_20 = arith.constant 0 : index
    %17 = vector.load %arg5[%c1, %c0_19, %c0_20] : memref<9x64x128xbf16, #tpu.memory_space<vmem>>, vector<1x64x128xbf16>
    %18 = vector.shape_cast %17 : vector<1x64x128xbf16> to vector<64x128xbf16>
    %cst_21 = arith.constant dense<0.000000e+00> : vector<16x128xf32>
    %19 = tpu.matmul %16, %18, %cst_21 {dimension_numbers = #tpu.dot_dimension_numbers<[1], [0], [0], [1], [0, 0, 1, 1], [], []>} : vector<16x64xbf16>, vector<64x128xbf16>, vector<16x128xf32> -> vector<16x128xf32>
    %20 = arith.addf %14, %19 : vector<16x128xf32>
    %21 = vector.extract_strided_slice %1 {offsets = [0, 1, 0], sizes = [4, 4, 64], strides = [1, 1, 1]} : vector<5x5x64xbf16> to vector<4x4x64xbf16>
    %22 = vector.shape_cast %21 : vector<4x4x64xbf16> to vector<16x64xbf16>
    %c2 = arith.constant 2 : index
    %c0_22 = arith.constant 0 : index
    %c0_23 = arith.constant 0 : index
    %23 = vector.load %arg5[%c2, %c0_22, %c0_23] : memref<9x64x128xbf16, #tpu.memory_space<vmem>>, vector<1x64x128xbf16>
    %24 = vector.shape_cast %23 : vector<1x64x128xbf16> to vector<64x128xbf16>
    %cst_24 = arith.constant dense<0.000000e+00> : vector<16x128xf32>
    %25 = tpu.matmul %22, %24, %cst_24 {dimension_numbers = #tpu.dot_dimension_numbers<[1], [0], [0], [1], [0, 0, 1, 1], [], []>} : vector<16x64xbf16>, vector<64x128xbf16>, vector<16x128xf32> -> vector<16x128xf32>
    %26 = arith.addf %20, %25 : vector<16x128xf32>
    %27 = vector.extract_strided_slice %5 {offsets = [0, 0, 0], sizes = [4, 4, 64], strides = [1, 1, 1]} : vector<5x5x64xbf16> to vector<4x4x64xbf16>
    %28 = vector.shape_cast %27 : vector<4x4x64xbf16> to vector<16x64xbf16>
    %c3 = arith.constant 3 : index
    %c0_25 = arith.constant 0 : index
    %c0_26 = arith.constant 0 : index
    %29 = vector.load %arg5[%c3, %c0_25, %c0_26] : memref<9x64x128xbf16, #tpu.memory_space<vmem>>, vector<1x64x128xbf16>
    %30 = vector.shape_cast %29 : vector<1x64x128xbf16> to vector<64x128xbf16>
    %cst_27 = arith.constant dense<0.000000e+00> : vector<16x128xf32>
    %31 = tpu.matmul %28, %30, %cst_27 {dimension_numbers = #tpu.dot_dimension_numbers<[1], [0], [0], [1], [0, 0, 1, 1], [], []>} : vector<16x64xbf16>, vector<64x128xbf16>, vector<16x128xf32> -> vector<16x128xf32>
    %32 = arith.addf %26, %31 : vector<16x128xf32>
    %33 = vector.extract_strided_slice %7 {offsets = [0, 0, 0], sizes = [4, 4, 64], strides = [1, 1, 1]} : vector<5x5x64xbf16> to vector<4x4x64xbf16>
    %34 = vector.shape_cast %33 : vector<4x4x64xbf16> to vector<16x64xbf16>
    %c4 = arith.constant 4 : index
    %c0_28 = arith.constant 0 : index
    %c0_29 = arith.constant 0 : index
    %35 = vector.load %arg5[%c4, %c0_28, %c0_29] : memref<9x64x128xbf16, #tpu.memory_space<vmem>>, vector<1x64x128xbf16>
    %36 = vector.shape_cast %35 : vector<1x64x128xbf16> to vector<64x128xbf16>
    %cst_30 = arith.constant dense<0.000000e+00> : vector<16x128xf32>
    %37 = tpu.matmul %34, %36, %cst_30 {dimension_numbers = #tpu.dot_dimension_numbers<[1], [0], [0], [1], [0, 0, 1, 1], [], []>} : vector<16x64xbf16>, vector<64x128xbf16>, vector<16x128xf32> -> vector<16x128xf32>
    %38 = arith.addf %32, %37 : vector<16x128xf32>
    %39 = vector.extract_strided_slice %5 {offsets = [0, 1, 0], sizes = [4, 4, 64], strides = [1, 1, 1]} : vector<5x5x64xbf16> to vector<4x4x64xbf16>
    %40 = vector.shape_cast %39 : vector<4x4x64xbf16> to vector<16x64xbf16>
    %c5 = arith.constant 5 : index
    %c0_31 = arith.constant 0 : index
    %c0_32 = arith.constant 0 : index
    %41 = vector.load %arg5[%c5, %c0_31, %c0_32] : memref<9x64x128xbf16, #tpu.memory_space<vmem>>, vector<1x64x128xbf16>
    %42 = vector.shape_cast %41 : vector<1x64x128xbf16> to vector<64x128xbf16>
    %cst_33 = arith.constant dense<0.000000e+00> : vector<16x128xf32>
    %43 = tpu.matmul %40, %42, %cst_33 {dimension_numbers = #tpu.dot_dimension_numbers<[1], [0], [0], [1], [0, 0, 1, 1], [], []>} : vector<16x64xbf16>, vector<64x128xbf16>, vector<16x128xf32> -> vector<16x128xf32>
    %44 = arith.addf %38, %43 : vector<16x128xf32>
    %45 = vector.extract_strided_slice %1 {offsets = [1, 0, 0], sizes = [4, 4, 64], strides = [1, 1, 1]} : vector<5x5x64xbf16> to vector<4x4x64xbf16>
    %46 = vector.shape_cast %45 : vector<4x4x64xbf16> to vector<16x64xbf16>
    %c6 = arith.constant 6 : index
    %c0_34 = arith.constant 0 : index
    %c0_35 = arith.constant 0 : index
    %47 = vector.load %arg5[%c6, %c0_34, %c0_35] : memref<9x64x128xbf16, #tpu.memory_space<vmem>>, vector<1x64x128xbf16>
    %48 = vector.shape_cast %47 : vector<1x64x128xbf16> to vector<64x128xbf16>
    %cst_36 = arith.constant dense<0.000000e+00> : vector<16x128xf32>
    %49 = tpu.matmul %46, %48, %cst_36 {dimension_numbers = #tpu.dot_dimension_numbers<[1], [0], [0], [1], [0, 0, 1, 1], [], []>} : vector<16x64xbf16>, vector<64x128xbf16>, vector<16x128xf32> -> vector<16x128xf32>
    %50 = arith.addf %44, %49 : vector<16x128xf32>
    %51 = vector.extract_strided_slice %3 {offsets = [1, 0, 0], sizes = [4, 4, 64], strides = [1, 1, 1]} : vector<5x5x64xbf16> to vector<4x4x64xbf16>
    %52 = vector.shape_cast %51 : vector<4x4x64xbf16> to vector<16x64xbf16>
    %c7 = arith.constant 7 : index
    %c0_37 = arith.constant 0 : index
    %c0_38 = arith.constant 0 : index
    %53 = vector.load %arg5[%c7, %c0_37, %c0_38] : memref<9x64x128xbf16, #tpu.memory_space<vmem>>, vector<1x64x128xbf16>
    %54 = vector.shape_cast %53 : vector<1x64x128xbf16> to vector<64x128xbf16>
    %cst_39 = arith.constant dense<0.000000e+00> : vector<16x128xf32>
    %55 = tpu.matmul %52, %54, %cst_39 {dimension_numbers = #tpu.dot_dimension_numbers<[1], [0], [0], [1], [0, 0, 1, 1], [], []>} : vector<16x64xbf16>, vector<64x128xbf16>, vector<16x128xf32> -> vector<16x128xf32>
    %56 = arith.addf %50, %55 : vector<16x128xf32>
    %57 = vector.extract_strided_slice %1 {offsets = [1, 1, 0], sizes = [4, 4, 64], strides = [1, 1, 1]} : vector<5x5x64xbf16> to vector<4x4x64xbf16>
    %58 = vector.shape_cast %57 : vector<4x4x64xbf16> to vector<16x64xbf16>
    %c8 = arith.constant 8 : index
    %c0_40 = arith.constant 0 : index
    %c0_41 = arith.constant 0 : index
    %59 = vector.load %arg5[%c8, %c0_40, %c0_41] : memref<9x64x128xbf16, #tpu.memory_space<vmem>>, vector<1x64x128xbf16>
    %60 = vector.shape_cast %59 : vector<1x64x128xbf16> to vector<64x128xbf16>
    %cst_42 = arith.constant dense<0.000000e+00> : vector<16x128xf32>
    %61 = tpu.matmul %58, %60, %cst_42 {dimension_numbers = #tpu.dot_dimension_numbers<[1], [0], [0], [1], [0, 0, 1, 1], [], []>} : vector<16x64xbf16>, vector<64x128xbf16>, vector<16x128xf32> -> vector<16x128xf32>
    %62 = arith.addf %56, %61 : vector<16x128xf32>
    %c0_43 = arith.constant 0 : index
    %c0_44 = arith.constant 0 : index
    %63 = vector.load %arg6[%c0_43, %c0_44] : memref<1x128xf32, #tpu.memory_space<vmem>>, vector<1x128xf32>
    %64 = vector.broadcast %63 : vector<1x128xf32> to vector<16x128xf32>
    %65 = arith.addf %62, %64 : vector<16x128xf32>
    %cst_45 = arith.constant 0.000000e+00 : f32
    %66 = vector.broadcast %cst_45 : f32 to vector<16x128xf32>
    %67 = arith.maximumf %65, %66 : vector<16x128xf32>
    %cst_46 = arith.constant dense<0.000000e+00> : vector<128xf32>
    %68 = vector.multi_reduction <add>, %67, %cst_46 [0] : vector<16x128xf32> to vector<128xf32>
    %69 = vector.shape_cast %68 : vector<128xf32> to vector<1x128xf32>
    %cst_47 = arith.constant 6.250000e-02 : f32
    %70 = vector.broadcast %cst_47 : f32 to vector<1x128xf32>
    %71 = arith.mulf %69, %70 : vector<1x128xf32>
    %c0_48 = arith.constant 0 : index
    %c0_49 = arith.constant 0 : index
    %c0_50 = arith.constant 0 : index
    %72 = vector.load %arg7[%c0_48, %c0_49, %c0_50] : memref<1x1x128xf32, #tpu.memory_space<vmem>>, vector<1x1x128xf32>
    %73 = vector.shape_cast %72 : vector<1x1x128xf32> to vector<1x128xf32>
    %74 = vector.shape_cast %71 : vector<1x128xf32> to vector<1x1x128xf32>
    tpu.vector_store %arg7[%c0_48, %c0_49, %c0_50], %74 {strides = array<i32>} : memref<1x1x128xf32, #tpu.memory_space<vmem>>, vector<1x1x128xf32>,
    return
  }
  func.func @transform_0(%arg0: i32) -> (i32, i32, i32, i32) {
    %c0_i32 = arith.constant 0 : i32
    %c0_i32_0 = arith.constant 0 : i32
    %c0_i32_1 = arith.constant 0 : i32
    %c0_i32_2 = arith.constant 0 : i32
    return %arg0, %c0_i32, %c0_i32_0, %c0_i32_1 : i32, i32, i32, i32
  }
  func.func @transform_1(%arg0: i32) -> (i32, i32, i32, i32) {
    %c0_i32 = arith.constant 0 : i32
    %c0_i32_0 = arith.constant 0 : i32
    %c0_i32_1 = arith.constant 0 : i32
    %c0_i32_2 = arith.constant 0 : i32
    return %arg0, %c0_i32, %c0_i32_0, %c0_i32_1 : i32, i32, i32, i32
  }
  func.func @transform_2(%arg0: i32) -> (i32, i32, i32, i32) {
    %c0_i32 = arith.constant 0 : i32
    %c0_i32_0 = arith.constant 0 : i32
    %c0_i32_1 = arith.constant 0 : i32
    %c0_i32_2 = arith.constant 0 : i32
    return %arg0, %c0_i32, %c0_i32_0, %c0_i32_1 : i32, i32, i32, i32
  }
  func.func @transform_3(%arg0: i32) -> (i32, i32, i32, i32) {
    %c0_i32 = arith.constant 0 : i32
    %c0_i32_0 = arith.constant 0 : i32
    %c0_i32_1 = arith.constant 0 : i32
    %c0_i32_2 = arith.constant 0 : i32
    return %arg0, %c0_i32, %c0_i32_0, %c0_i32_1 : i32, i32, i32, i32
  }
  func.func @transform_4(%arg0: i32) -> (i32, i32, i32) {
    %c0_i32 = arith.constant 0 : i32
    %c0_i32_0 = arith.constant 0 : i32
    %c0_i32_1 = arith.constant 0 : i32
    %c0_i32_2 = arith.constant 0 : i32
    return %c0_i32, %c0_i32_0, %c0_i32_1 : i32, i32, i32
  }
  func.func @transform_5(%arg0: i32) -> (i32, i32) {
    %c0_i32 = arith.constant 0 : i32
    %c0_i32_0 = arith.constant 0 : i32
    %c0_i32_1 = arith.constant 0 : i32
    return %c0_i32, %c0_i32_0 : i32, i32
  }
  func.func @transform_6(%arg0: i32) -> (i32, i32, i32) {
    %c0_i32 = arith.constant 0 : i32
    %c0_i32_0 = arith.constant 0 : i32
    %c0_i32_1 = arith.constant 0 : i32
    return %arg0, %c0_i32, %c0_i32_0 : i32, i32, i32
  }
}

module attributes {stable_mosaic.version = 11 : i64} {
  func.func @_tail_kernel(%arg0: i32, %arg1: memref<2x128xf32, #tpu.memory_space<vmem>>, %arg2: memref<128x512xbf16, #tpu.memory_space<vmem>>, %arg3: memref<1x512xf32, #tpu.memory_space<vmem>>, %arg4: memref<512x128xbf16, #tpu.memory_space<vmem>>, %arg5: memref<1x128xf32, #tpu.memory_space<vmem>>, %arg6: memref<128x128xbf16, #tpu.memory_space<vmem>>, %arg7: memref<1x128xf32, #tpu.memory_space<vmem>>, %arg8: memref<2x128xf32, #tpu.memory_space<vmem>>) attributes {dimension_semantics = [#tpu.dimension_semantics<arbitrary>], iteration_bounds = array<i64: 1>, scalar_prefetch = 0 : i64, scratch_operands = 0 : i64, tpu.core_type = #tpu.core_type<tc>, window_params = [{pipeline_mode = #tpu.pipeline_mode<synchronous>, transform_indices = @transform_0, window_bounds = array<i64: 2, 128>}, {pipeline_mode = #tpu.pipeline_mode<synchronous>, transform_indices = @transform_1, window_bounds = array<i64: 128, 512>}, {pipeline_mode = #tpu.pipeline_mode<synchronous>, transform_indices = @transform_2, window_bounds = array<i64: 1, 512>}, {pipeline_mode = #tpu.pipeline_mode<synchronous>, transform_indices = @transform_3, window_bounds = array<i64: 512, 128>}, {pipeline_mode = #tpu.pipeline_mode<synchronous>, transform_indices = @transform_4, window_bounds = array<i64: 1, 128>}, {pipeline_mode = #tpu.pipeline_mode<synchronous>, transform_indices = @transform_5, window_bounds = array<i64: 128, 128>}, {pipeline_mode = #tpu.pipeline_mode<synchronous>, transform_indices = @transform_6, window_bounds = array<i64: 1, 128>}, {pipeline_mode = #tpu.pipeline_mode<synchronous>, transform_indices = @transform_7, window_bounds = array<i64: 2, 128>}]} {
    %c0 = arith.constant 0 : index
    %c0_0 = arith.constant 0 : index
    %0 = vector.load %arg1[%c0, %c0_0] : memref<2x128xf32, #tpu.memory_space<vmem>>, vector<2x128xf32>
    %1 = arith.truncf %0 : vector<2x128xf32> to vector<2x128xbf16>
    %c0_1 = arith.constant 0 : index
    %c0_2 = arith.constant 0 : index
    %2 = vector.load %arg2[%c0_1, %c0_2] : memref<128x512xbf16, #tpu.memory_space<vmem>>, vector<128x512xbf16>
    %cst = arith.constant dense<0.000000e+00> : vector<2x512xf32>
    %3 = tpu.matmul %1, %2, %cst {dimension_numbers = #tpu.dot_dimension_numbers<[1], [0], [0], [1], [0, 0, 1, 1], [], []>} : vector<2x128xbf16>, vector<128x512xbf16>, vector<2x512xf32> -> vector<2x512xf32>
    %c0_3 = arith.constant 0 : index
    %c0_4 = arith.constant 0 : index
    %4 = vector.load %arg3[%c0_3, %c0_4] : memref<1x512xf32, #tpu.memory_space<vmem>>, vector<1x512xf32>
    %5 = vector.broadcast %4 : vector<1x512xf32> to vector<2x512xf32>
    %6 = arith.addf %3, %5 : vector<2x512xf32>
    %7 = arith.truncf %6 : vector<2x512xf32> to vector<2x512xbf16>
    %c0_5 = arith.constant 0 : index
    %c0_6 = arith.constant 0 : index
    %8 = vector.load %arg4[%c0_5, %c0_6] : memref<512x128xbf16, #tpu.memory_space<vmem>>, vector<512x128xbf16>
    %cst_7 = arith.constant dense<0.000000e+00> : vector<2x128xf32>
    %9 = tpu.matmul %7, %8, %cst_7 {dimension_numbers = #tpu.dot_dimension_numbers<[1], [0], [0], [1], [0, 0, 1, 1], [], []>} : vector<2x512xbf16>, vector<512x128xbf16>, vector<2x128xf32> -> vector<2x128xf32>
    %c0_8 = arith.constant 0 : index
    %c0_9 = arith.constant 0 : index
    %10 = vector.load %arg5[%c0_8, %c0_9] : memref<1x128xf32, #tpu.memory_space<vmem>>, vector<1x128xf32>
    %11 = vector.broadcast %10 : vector<1x128xf32> to vector<2x128xf32>
    %12 = arith.addf %9, %11 : vector<2x128xf32>
    %cst_10 = arith.constant 0.000000e+00 : f32
    %13 = vector.broadcast %cst_10 : f32 to vector<2x128xf32>
    %14 = arith.maximumf %12, %13 : vector<2x128xf32>
    %15 = arith.truncf %14 : vector<2x128xf32> to vector<2x128xbf16>
    %c0_11 = arith.constant 0 : index
    %c0_12 = arith.constant 0 : index
    %16 = vector.load %arg6[%c0_11, %c0_12] : memref<128x128xbf16, #tpu.memory_space<vmem>>, vector<128x128xbf16>
    %cst_13 = arith.constant dense<0.000000e+00> : vector<2x128xf32>
    %17 = tpu.matmul %15, %16, %cst_13 {dimension_numbers = #tpu.dot_dimension_numbers<[1], [0], [0], [1], [0, 0, 1, 1], [], []>} : vector<2x128xbf16>, vector<128x128xbf16>, vector<2x128xf32> -> vector<2x128xf32>
    %c0_14 = arith.constant 0 : index
    %c0_15 = arith.constant 0 : index
    %18 = vector.load %arg7[%c0_14, %c0_15] : memref<1x128xf32, #tpu.memory_space<vmem>>, vector<1x128xf32>
    %19 = vector.broadcast %18 : vector<1x128xf32> to vector<2x128xf32>
    %20 = arith.addf %17, %19 : vector<2x128xf32>
    %c0_16 = arith.constant 0 : index
    %c0_17 = arith.constant 0 : index
    %21 = vector.load %arg8[%c0_16, %c0_17] : memref<2x128xf32, #tpu.memory_space<vmem>>, vector<2x128xf32>
    tpu.vector_store %arg8[%c0_16, %c0_17], %20 {strides = array<i32>} : memref<2x128xf32, #tpu.memory_space<vmem>>, vector<2x128xf32>,
    return
  }
  func.func @transform_0(%arg0: i32) -> (i32, i32) {
    %c0_i32 = arith.constant 0 : i32
    %c0_i32_0 = arith.constant 0 : i32
    %c0_i32_1 = arith.constant 0 : i32
    return %c0_i32, %c0_i32_0 : i32, i32
  }
  func.func @transform_1(%arg0: i32) -> (i32, i32) {
    %c0_i32 = arith.constant 0 : i32
    %c0_i32_0 = arith.constant 0 : i32
    %c0_i32_1 = arith.constant 0 : i32
    return %c0_i32, %c0_i32_0 : i32, i32
  }
  func.func @transform_2(%arg0: i32) -> (i32, i32) {
    %c0_i32 = arith.constant 0 : i32
    %c0_i32_0 = arith.constant 0 : i32
    %c0_i32_1 = arith.constant 0 : i32
    return %c0_i32, %c0_i32_0 : i32, i32
  }
  func.func @transform_3(%arg0: i32) -> (i32, i32) {
    %c0_i32 = arith.constant 0 : i32
    %c0_i32_0 = arith.constant 0 : i32
    %c0_i32_1 = arith.constant 0 : i32
    return %c0_i32, %c0_i32_0 : i32, i32
  }
  func.func @transform_4(%arg0: i32) -> (i32, i32) {
    %c0_i32 = arith.constant 0 : i32
    %c0_i32_0 = arith.constant 0 : i32
    %c0_i32_1 = arith.constant 0 : i32
    return %c0_i32, %c0_i32_0 : i32, i32
  }
  func.func @transform_5(%arg0: i32) -> (i32, i32) {
    %c0_i32 = arith.constant 0 : i32
    %c0_i32_0 = arith.constant 0 : i32
    %c0_i32_1 = arith.constant 0 : i32
    return %c0_i32, %c0_i32_0 : i32, i32
  }
  func.func @transform_6(%arg0: i32) -> (i32, i32) {
    %c0_i32 = arith.constant 0 : i32
    %c0_i32_0 = arith.constant 0 : i32
    %c0_i32_1 = arith.constant 0 : i32
    return %c0_i32, %c0_i32_0 : i32, i32
  }
  func.func @transform_7(%arg0: i32) -> (i32, i32) {
    %c0_i32 = arith.constant 0 : i32
    %c0_i32_0 = arith.constant 0 : i32
    %c0_i32_1 = arith.constant 0 : i32
    return %c0_i32, %c0_i32_0 : i32, i32
  }
}

</mosaic_0001>

<bundles_post_ra>
// kernel: classifier_forward.3
= control target key start
LH: loop header
LB: loop body
LE: loop exit
PB: predicated region body
PF: predicated region fallthrough
CT: control target
= control target key end

     0   :  { %s1221_s21 = smov 0   ;;  %s1615_s0 = inlined_call_operand.vmem [shape: f32[2,9,9,3], index: 0, kind: input, shape index: {}]   ;;  %s1616_s1 = inlined_call_operand.vmem [shape: f32[2,9,9,3], index: 1, kind: input, shape index: {}]   ;;  %s1617_s2 = inlined_call_operand.vmem [shape: f32[2,9,9,3], index: 2, kind: input, shape index: {}]   ;;  %s1618_s3 = inlined_call_operand.vmem [shape: f32[2,9,9,3], index: 3, kind: input, shape index: {}]   ;;  %s1619_s4 = inlined_call_operand.vmem [shape: bf16[9,3,64], index: 4, kind: input, shape index: {}]   ;;  %s1620_s5 = inlined_call_operand.vmem [shape: f32[1,64], index: 5, kind: input, shape index: {}]   ;;  %s1621_s6 = inlined_call_operand.vmem [shape: bf16[2,64,64], index: 6, kind: output, shape index: {}]  }
   0x1 LB: > { %s1105_s22 = sadd.s32 4294967295, %s1183_s21   ;;  %p1109_p0 = scmp.ge.s32.totalorder %s1183_s21, 1  ;;  %s1183_s21 = sphi %s1221_s21, %s16_s21  }
   0x2   : > { %p242_p1 = scmp.lt.s32.totalorder %s1183_s21, 3 }
   0x4   : > { %p243_p2 = pnand %p1109_p0, %p242_p1 }
   0x5   : > { %p287_p3 = scmp.lt.s32.totalorder (!%p243_p2), %s1105_s22, 1 }
   0x6   : > { %246 = sbr.rel (%p243_p2) target bundleno = 303 (0x12f), region = 44 }
   0xb   : > { %v1116_v0 = vld [vmem:[%s1619_s4 + $0x2] sm:$0x3]  ;;  %vm388_vm0 = vcmask 1040384   ;;  %vm389_vm1 = vcmask 1041408   ;;  %v1185_v1 = vmov 65535   ;;  %s1623_s22 = smov (!%p287_p3, %s1105_s22), 1 }
   0xc   : > { %v390_v2 = vsel %vm388_vm0, 4294967295, %v1185_v1  ;;  %v1125_v3 = vld [vmem:[%s1619_s4 + $0x4] sm:$0x3]  ;;  %v1130_v4 = vld [vmem:[%s1619_s4 + $0x6] sm:$0x3]  ;;  %s1247_s9 = smul.u32 144, %s1623_s22 }
   0xd   : > { %v391_v5 = vsel %vm389_vm1, %v390_v2, 0  ;;  %v368_v6 = vld [vmem:[%s1619_s4] sm:$0x3]  ;;  %v1135_v7 = vld [vmem:[%s1619_s4 + $0x8] sm:$0x3]  ;;  %vm375_vm2 = vcmask 23552  }
   0xe   : > { %v393_v8 = vand.u32 %v1116_v0, %v391_v5  ;;  %v536_v9 = vand.u32 %v1125_v3, %v391_v5  ;;  %v594_v10 = vand.u32 %v1130_v4, %v391_v5  ;;  %v437_v11 = vand.u32 %v391_v5, %v368_v6  ;;  %v1145_v13 = vld [vmem:[%s1619_s4 + $0xc] sm:$0x3]  ;;  %s1256_s14 = scalar_lea.vmem %s1616_s1, %s1247_s9  ;;  %v1150_v14 = vld [vmem:[%s1619_s4 + $0xe] sm:$0x3]  ;;  %v1140_v15 = vld [vmem:[%s1619_s4 + $0xa] sm:$0x3]  ;;  %s1291_s25 = scalar_lea.vmem %s1615_s0, %s1247_s9 }
   0xf   : > { %v652_v12 = vand.u32 %v1135_v7, %v391_v5  ;;  %v1155_v16 = vld [vmem:[%s1619_s4 + $0x10] sm:$0x3]  ;;  %v1268_v17 = vld [vmem:[%s1256_s14 + $0x20] sm:$0xff]  ;;  %v816_v24 = vand.u32 %v1145_v13, %v391_v5  ;;  %v874_v29 = vand.u32 %v1150_v14, %v391_v5  ;;  %v758_v30 = vand.u32 %v1140_v15, %v391_v5  ;;  %v314_v36 = vld [vmem:[%s1291_s25 + $0x8] sm:$0x1]  ;;  %s1319_s28 = scalar_lea.vmem %s1617_s2, %s1247_s9  ;;  %s1325_s7 = scalar_lea.vmem %s1618_s3, %s1247_s9 }
  0x10   : > { %1163 = vmatpush.bf16.msra.mxu1 %v393_v8  ;;  %1164 = vmatpush.bf16.msra.mxu2 %v393_v8  ;;  %v1271_v18 = vld [vmem:[%s1256_s14 + $0x30] sm:$0xff]  ;;  %v1274_v19 = vld [vmem:[%s1256_s14 + $0x40] sm:$0xff]  ;;  %v938_v33 = vand.u32 %v1155_v16, %v391_v5  ;;  %v316_v37 = vld [vmem:[%s1291_s25 + $0x18] sm:$0x1]  ;;  %v486_v40 = vrot.slane %v314_v36, 1  ;;  %vm484_vm3 = vcmask 1046528  }
  0x11   : > { %1165 = vmatpush.bf16.msra.mxu3 %v393_v8  ;;  %402 = vmatpush.bf16.msra.mxu0 %v393_v8  ;;  %v370_v20 = vpack.c.bf16 %v1271_v18, %v1268_v17  ;;  %v1279_v21 = vld [vmem:[%s1256_s14 + $0x50] sm:$0xff]  ;;  %v1282_v22 = vld [vmem:[%s1256_s14 + $0x60] sm:$0xff]  ;;  %v489_v41 = vrot.slane %v316_v37, 1  ;;  %v318_v54 = vld [vmem:[%s1291_s25 + $0x28] sm:$0x1]  ;;  %s1162_s10 = sshll.u32 %s1623_s22, 5 }
  0x12   : > { %v1285_v23 = vld [vmem:[%s1256_s14 + $0x70] sm:$0xff]  ;;  %v371_v25 = vpack.c.bf16 %v1279_v21, %v1274_v19  ;;  %v331_v27 = vld [vmem:[%s1256_s14] sm:$0xff]  ;;  %v320_v55 = vld [vmem:[%s1291_s25 + $0x38] sm:$0x1]  ;;  %v492_v58 = vrot.slane %v318_v54, 1  ;;  %s1565_s13 = scalar_lea.vmem %s1621_s6, %s1162_s10  ;;  %vm1005_vm4 = vcmask 519168  }
  0x13   : > { %v372_v26 = vpack.c.bf16 %v1285_v23, %v1282_v22  ;;  %v1299_v28 = vld [vmem:[%s1256_s14 + $0x10] sm:$0xff]  ;;  %1118 = vmatmul.msk.bf16.vlgmr.msra.gmra.mxu1 %vm375_vm2, %v370_v20  ;;  %v313_v34 = vld [vmem:[%s1291_s25] sm:$0xff]  ;;  %v495_v59 = vrot.slane %v320_v55, 1  ;;  %v322_v8 = vld [vmem:[%s1291_s25 + $0x48] sm:$0x1] }
  0x14   : > { %545 = vmatpush.bf16.msrb.mxu2 %v536_v9  ;;  %446 = vmatpush.bf16.msrb.mxu1 %v437_v11  ;;  %v369_v31 = vpack.c.bf16 %v1299_v28, %v331_v27  ;;  %v855_v32 = vpack.c.bf16 %v1268_v17, %v1299_v28  ;;  %v1310_v35 = vld [vmem:[%s1291_s25 + $0x10] sm:$0xff]  ;;  %v485_v38 = vrot.slane %v313_v34, 1  ;;  %v1332_v44 = vld [vmem:[%s1319_s28] sm:$0xff]  ;;  %v324_v9 = vld [vmem:[%s1291_s25 + $0x58] sm:$0x1]  ;;  %v856_v28 = vpack.c.bf16 %v1274_v19, %v1271_v18 }
  0x15   : > { %603 = vmatpush.bf16.msrb.mxu3 %v594_v10  ;;  %661 = vmatpush.bf16.msrb.mxu0 %v652_v12  ;;  %v488_v39 = vrot.slane %v1310_v35, 1  ;;  %v1335_v45 = vld [vmem:[%s1319_s28 + $0x10] sm:$0xff]  ;;  %v356_v46 = vld [vmem:[%s1325_s7] sm:$0xff]  ;;  %v364_v48 = vpack.c.bf16 %v1310_v35, %v313_v34  ;;  %v498_v12 = vrot.slane %v322_v8, 1  ;;  %v501_v13 = vrot.slane %v324_v9, 1 }
  0x16   : > { %1119 = vmatmul.msk.bf16.vlgmr.msra.gmra.mxu2 %vm375_vm2, %v371_v25  ;;  %1120 = vmatmul.msk.bf16.vlgmr.msra.gmra.mxu3 %vm375_vm2, %v372_v26  ;;  %v487_v42 = vsel %vm484_vm3, %v485_v38, %v486_v40  ;;  %v357_v47 = vld [vmem:[%s1325_s7 + $0x10] sm:$0xff]  ;;  %v575_v50 = vpack.c.bf16 %v1335_v45, %v1332_v44  ;;  %v1348_v52 = vld [vmem:[%s1291_s25 + $0x20] sm:$0xff]  ;;  %v326_v34 = vld [vmem:[%s1291_s25 + $0x68] sm:$0x1] }
  0x17   : > { %1117 = vmatmul.msk.bf16.vlgmr.msra.gmra.mxu0 %vm375_vm2, %v369_v31  ;;  %v1329_v43 = vsel %vm484_vm3, %v488_v39, %v489_v41  ;;  %v633_v51 = vpack.c.bf16 %v357_v47, %v356_v46  ;;  %v1351_v53 = vld [vmem:[%s1291_s25 + $0x30] sm:$0xff]  ;;  %v491_v56 = vrot.slane %v1348_v52, 1  ;;  %v1364_v62 = vld [vmem:[%s1319_s28 + $0x20] sm:$0xff]  ;;  %v328_v36 = vld [vmem:[%s1291_s25 + $0x78] sm:$0x1]  ;;  %v504_v39 = vrot.slane %v326_v34, 1 }
  0x18   : > { %825 = vmatpush.bf16.msra.mxu2 %v816_v24  ;;  %767 = vmatpush.bf16.msra.mxu1 %v758_v30  ;;  %v517_v49 = vpack.c.bf16 %v1329_v43, %v487_v42  ;;  %v494_v57 = vrot.slane %v1351_v53, 1  ;;  %v1367_v63 = vld [vmem:[%s1319_s28 + $0x30] sm:$0xff]  ;;  %v358_v0 = vld [vmem:[%s1325_s7 + $0x20] sm:$0xff]  ;;  %v365_v2 = vpack.c.bf16 %v1351_v53, %v1348_v52  ;;  %v507_v40 = vrot.slane %v328_v36, 1 }
  0x19   : > { %883 = vmatpush.bf16.msra.mxu3 %v874_v29  ;;  %947 = vmatpush.bf16.msra.mxu0 %v938_v33  ;;  %v1358_v60 = vsel %vm484_vm3, %v491_v56, %v492_v58  ;;  %v359_v1 = vld [vmem:[%s1325_s7 + $0x30] sm:$0xff]  ;;  %v576_v4 = vpack.c.bf16 %v1367_v63, %v1364_v62  ;;  %v1382_v6 = vld [vmem:[%s1291_s25 + $0x40] sm:$0xff]  ;;  %v341_v56 = vld [vmem:[%s1319_s28 + $0x8] sm:$0x1]  ;;  %v707_v58 = vrot.slane %v1332_v44, 1 }
  0x1a   : > { %v1361_v61 = vsel %vm484_vm3, %v494_v57, %v495_v59  ;;  %v634_v5 = vpack.c.bf16 %v359_v1, %v358_v0  ;;  %v1385_v7 = vld [vmem:[%s1291_s25 + $0x50] sm:$0xff]  ;;  %v497_v10 = vrot.slane %v1382_v6, 1  ;;  %v1398_v16 = vld [vmem:[%s1319_s28 + $0x40] sm:$0xff]  ;;  %v343_v57 = vld [vmem:[%s1319_s28 + $0x18] sm:$0x1]  ;;  %v710_v59 = vrot.slane %v1335_v45, 1 }
  0x1b   : > { %v518_v3 = vpack.c.bf16 %v1361_v61, %v1358_v60  ;;  %v500_v11 = vrot.slane %v1385_v7, 1  ;;  %v1401_v20 = vld [vmem:[%s1319_s28 + $0x50] sm:$0xff]  ;;  %v360_v24 = vld [vmem:[%s1325_s7 + $0x40] sm:$0xff]  ;;  %v366_v26 = vpack.c.bf16 %v1385_v7, %v1382_v6  ;;  %v708_v0 = vrot.slane %v341_v56, 1  ;;  %v345_v44 = vld [vmem:[%s1319_s28 + $0x28] sm:$0x1] }
  0x1c   : > { %v1392_v14 = vsel %vm484_vm3, %v497_v10, %v498_v12  ;;  %v361_v25 = vld [vmem:[%s1325_s7 + $0x50] sm:$0xff]  ;;  %v577_v29 = vpack.c.bf16 %v1401_v20, %v1398_v16  ;;  %v1416_v31 = vld [vmem:[%s1291_s25 + $0x60] sm:$0xff]  ;;  %v711_v1 = vrot.slane %v343_v57, 1  ;;  %v919_v8 = vpack.c.bf16 %v1358_v60, %v1329_v43  ;;  %v347_v45 = vld [vmem:[%s1319_s28 + $0x38] sm:$0x1] }
  0x1d   : > { %v1395_v15 = vsel %vm484_vm3, %v500_v11, %v501_v13  ;;  %v635_v30 = vpack.c.bf16 %v361_v25, %v360_v24  ;;  %v1419_v33 = vld [vmem:[%s1291_s25 + $0x70] sm:$0xff]  ;;  %v503_v37 = vrot.slane %v1416_v31, 1  ;;  %v1430_v46 = vld [vmem:[%s1319_s28 + $0x60] sm:$0xff]  ;;  %v714_v43 = vrot.slane %v345_v44, 1 }
  0x1e   : > { %v519_v27 = vpack.c.bf16 %v1395_v15, %v1392_v14  ;;  %v506_v38 = vrot.slane %v1419_v33, 1  ;;  %v1433_v47 = vld [vmem:[%s1319_s28 + $0x70] sm:$0xff]  ;;  %v717_v60 = vrot.slane %v347_v45, 1  ;;  %v798_v17 = vpack.c.bf16 %v1382_v6, %v1351_v53  ;;  %v339_v36 = vld [vmem:[%s1256_s14 + $0x80] sm:$0xff] }
  0x1f   : > { %v505_v41 = vsel %vm484_vm3, %v503_v37, %v504_v39  ;;  %v578_v54 = vpack.c.bf16 %v1433_v47, %v1430_v46  ;;  %v719_v53 = vrot.slane %v1398_v16, 1  ;;  %v722_v18 = vrot.slane %v1401_v20, 1  ;;  %v353_v16 = vld [vmem:[%s1319_s28 + $0x68] sm:$0x1]  ;;  %v355_v20 = vld [vmem:[%s1319_s28 + $0x78] sm:$0x1] }
  0x20   : > { %v1427_v42 = vsel %vm484_vm3, %v506_v38, %v507_v40  ;;  %v857_v24 = vpack.c.bf16 %v1282_v22, %v1279_v21  ;;  %v921_v25 = vpack.c.bf16 %v505_v41, %v1395_v15  ;;  %v726_v21 = vrot.slane %v353_v16, 1 }
  0x21   : > { %v729_v22 = vrot.slane %v355_v20, 1 }
  0x23   : > { %1121 = vmatmul.msk.bf16.vlgmr.msrb.gmra.mxu1 %vm375_vm2, %v364_v48  ;;  %v362_v48 = vld [vmem:[%s1325_s7 + $0x60] sm:$0xff] }
  0x26   : > { %1126 = vmatmul.msk.bf16.vlgmr.msrb.gmra.mxu2 %vm375_vm2, %v517_v49  ;;  %1131 = vmatmul.msk.bf16.vlgmr.msrb.gmra.mxu3 %vm375_vm2, %v575_v50  ;;  %v363_v49 = vld [vmem:[%s1325_s7 + $0x70] sm:$0xff]  ;;  %v367_v50 = vpack.c.bf16 %v1419_v33, %v1416_v31 }
  0x27   : > { %1136 = vmatmul.msk.bf16.vlgmr.msrb.gmra.mxu0 %vm375_vm2, %v633_v51  ;;  %v520_v51 = vpack.c.bf16 %v1427_v42, %v505_v41  ;;  %v636_v55 = vpack.c.bf16 %v363_v49, %v362_v48  ;;  %v858_v41 = vpack.c.bf16 %v339_v36, %v1285_v23 }
  0x33   : > { %1122 = vmatmul.msk.bf16.gmra.mxu1 %vm375_vm2, %v365_v2  ;;  %v709_v2 = vsel %vm484_vm3, %v707_v58, %v708_v0 }
  0x36   : > { %1127 = vmatmul.msk.bf16.gmra.mxu2 %vm375_vm2, %v518_v3  ;;  %1132 = vmatmul.msk.bf16.gmra.mxu3 %vm375_vm2, %v576_v4  ;;  %v712_v3 = vsel %vm484_vm3, %v710_v59, %v711_v1 }
  0x37   : > { %1137 = vmatmul.msk.bf16.gmra.mxu0 %vm375_vm2, %v634_v5  ;;  %v739_v4 = vpack.c.bf16 %v712_v3, %v709_v2  ;;  %v797_v5 = vpack.c.bf16 %v1348_v52, %v1310_v35  ;;  %v713_v35 = vrot.slane %v1364_v62, 1  ;;  %v716_v52 = vrot.slane %v1367_v63, 1  ;;  %v349_v62 = vld [vmem:[%s1319_s28 + $0x48] sm:$0x1]  ;;  %v351_v63 = vld [vmem:[%s1319_s28 + $0x58] sm:$0x1] }
  0x38   : > { %v720_v19 = vrot.slane %v349_v62, 1 }
  0x39   : > { %v715_v9 = vsel %vm484_vm3, %v713_v35, %v714_v43  ;;  %v718_v10 = vsel %vm484_vm3, %v716_v52, %v717_v60 }
  0x3a   : > { %v740_v11 = vpack.c.bf16 %v718_v10, %v715_v9  ;;  %v721_v6 = vsel %vm484_vm3, %v719_v53, %v720_v19 }
  0x43   : > { %1123 = vmatmul.msk.bf16.gmra.mxu1 %vm375_vm2, %v366_v26  ;;  %v329_v26 = vld [vmem:[%s1291_s25 + $0x80] sm:$0xff] }
  0x44   : > { %v915_v15 = vrot.slane %v329_v26, 1  ;;  %v800_v40 = vpack.c.bf16 %v329_v26, %v1419_v33 }
  0x46   : > { %1128 = vmatmul.msk.bf16.gmra.mxu2 %vm375_vm2, %v519_v27  ;;  %1133 = vmatmul.msk.bf16.gmra.mxu3 %vm375_vm2, %v577_v29  ;;  %v330_v27 = vld [vmem:[%s1291_s25 + $0x88] sm:$0x1]  ;;  %v728_v29 = vrot.slane %v1433_v47, 1 }
  0x47   : > { %1138 = vmatmul.msk.bf16.gmra.mxu0 %vm375_vm2, %v635_v30  ;;  %v916_v30 = vrot.slane %v330_v27, 1 }
  0x48   : > { %v730_v34 = vsel %vm484_vm3, %v728_v29, %v729_v22 }
  0x49   : > { %v917_v37 = vsel %vm484_vm3, %v915_v15, %v916_v30 }
  0x53   : > { %1124 = vmatmul.msk.bf16.gmra.mxu1 %vm375_vm2, %v367_v50 }
  0x56   : > { %1129 = vmatmul.msk.bf16.gmra.mxu2 %vm375_vm2, %v520_v51  ;;  %1134 = vmatmul.msk.bf16.gmra.mxu3 %vm375_vm2, %v578_v54 }
  0x57   : > { %1139 = vmatmul.msk.bf16.gmra.mxu0 %vm375_vm2, %v636_v55 }
  0x63   : > { %1141 = vmatmul.msk.bf16.vlgmr.msra.gmra.mxu1 %vm375_vm2, %v739_v4 }
  0x66   : > { %1146 = vmatmul.msk.bf16.vlgmr.msra.gmra.mxu2 %vm375_vm2, %v797_v5  ;;  %1151 = vmatmul.msk.bf16.vlgmr.msra.gmra.mxu3 %vm375_vm2, %v855_v32  ;;  %v920_v32 = vpack.c.bf16 %v1392_v14, %v1361_v61  ;;  %v723_v61 = vrot.slane %v351_v63, 1  ;;  %v799_v14 = vpack.c.bf16 %v1416_v31, %v1385_v7  ;;  %v725_v7 = vrot.slane %v1430_v46, 1 }
  0x67   : > { %1156 = vmatmul.msk.bf16.vlgmr.msra.gmra.mxu0 %vm375_vm2, %v919_v8  ;;  %v922_v46 = vpack.c.bf16 %v917_v37, %v1427_v42 }
  0x68   : > { %v724_v12 = vsel %vm484_vm3, %v722_v18, %v723_v61  ;;  %v727_v31 = vsel %vm484_vm3, %v725_v7, %v726_v21 }
  0x69   : > { %v741_v13 = vpack.c.bf16 %v724_v12, %v721_v6  ;;  %v742_v38 = vpack.c.bf16 %v730_v34, %v727_v31  ;;  %v1558_v31 = vld [vmem:[%s1620_s5] ss:$0 sm:$0xff] }
  0x73   : > { %1142 = vmatmul.msk.bf16.gmra.mxu1 %vm375_vm2, %v740_v11 }
  0x76   : > { %1147 = vmatmul.msk.bf16.gmra.mxu2 %vm375_vm2, %v798_v17  ;;  %1152 = vmatmul.msk.bf16.gmra.mxu3 %vm375_vm2, %v856_v28 }
  0x77   : > { %1157 = vmatmul.msk.bf16.gmra.mxu0 %vm375_vm2, %v920_v32 }
  0x83   : > { %1143 = vmatmul.msk.bf16.gmra.mxu1 %vm375_vm2, %v741_v13 }
  0x86   : > { %1148 = vmatmul.msk.bf16.gmra.mxu2 %vm375_vm2, %v799_v14  ;;  %1153 = vmatmul.msk.bf16.gmra.mxu3 %vm375_vm2, %v857_v24 }
  0x87   : > { %1158 = vmatmul.msk.bf16.gmra.mxu0 %vm375_vm2, %v921_v25 }
  0x90   : > { %v409_v39 = vpop.f32.mrf.mxu1 }
  0x93   : > { %1144 = vmatmul.msk.bf16.gmra.mxu1 %vm375_vm2, %v742_v38 }
  0x94   : > { %v404_v47 = vpop.f32.mrf.mxu0 }
  0x96   : > { %1149 = vmatmul.msk.bf16.gmra.mxu2 %vm375_vm2, %v800_v40  ;;  %1154 = vmatmul.msk.bf16.gmra.mxu3 %vm375_vm2, %v858_v41 }
  0x97   : > { %1159 = vmatmul.msk.bf16.gmra.mxu0 %vm375_vm2, %v922_v46 }
  0x98   : > { %v1515_v50 = vpop.f32.mrf.mxu1 }
  0x99   : > { %v1511_v48 = vpop.f32.mrf.mxu2  ;;  %v1513_v49 = vpop.f32.mrf.mxu3 }
  0x9c   : > { %v406_v33 = vpop.f32.mrf.mxu0 }
  0xa0   : > { %v448_v42 = vpop.f32.mrf.mxu1 }
  0xa1   : > { %v1517_v51 = vpop.f32.mrf.mxu2  ;;  %v1519_v23 = vpop.f32.mrf.mxu3  ;;  %v449_v18 = vadd.f32 %v448_v42, %v404_v47 }
  0xa4   : > { %v663_v54 = vpop.f32.mrf.mxu0 }
  0xa8   : > { %v450_v57 = vpop.f32.mrf.mxu1 }
  0xa9   : > { %v547_v55 = vpop.f32.mrf.mxu2  ;;  %v605_v56 = vpop.f32.mrf.mxu3  ;;  %v451_v24 = vadd.f32 %v450_v57, %v406_v33 }
  0xaa   : > { %v567_v61 = vadd.f32 %v547_v55, %v449_v18 }
  0xac   : > { %v665_v58 = vpop.f32.mrf.mxu0  ;;  %v625_v13 = vadd.f32 %v605_v56, %v567_v61 }
  0xae   : > { %v683_v20 = vadd.f32 %v663_v54, %v625_v13 }
  0xb0   : > { %v453_v1 = vpop.f32.mrf.mxu1 }
  0xb1   : > { %v549_v59 = vpop.f32.mrf.mxu2  ;;  %v607_v0 = vpop.f32.mrf.mxu3  ;;  %v454_v15 = vadd.f32 %v453_v1, %v409_v39 }
  0xb2   : > { %v568_v16 = vadd.f32 %v549_v59, %v451_v24 }
  0xb4   : > { %v668_v2 = vpop.f32.mrf.mxu0  ;;  %v626_v29 = vadd.f32 %v607_v0, %v568_v16 }
  0xb6   : > { %v684_v38 = vadd.f32 %v665_v58, %v626_v29 }
  0xb8   : > { %v455_v5 = vpop.f32.mrf.mxu1 }
  0xb9   : > { %v552_v3 = vpop.f32.mrf.mxu2  ;;  %v610_v4 = vpop.f32.mrf.mxu3  ;;  %v456_v55 = vadd.f32 %v455_v5, %v1515_v50 }
  0xba   : > { %v569_v36 = vadd.f32 %v552_v3, %v454_v15 }
  0xbc   : > { %v1521_v8 = vpop.f32.mrf.mxu0  ;;  %v627_v33 = vadd.f32 %v610_v4, %v569_v36 }
  0xbe   : > { %v685_v1 = vadd.f32 %v668_v2, %v627_v33 }
  0xc0   : > { %v1523_v35 = vpop.f32.mrf.mxu1 }
  0xc1   : > { %v554_v44 = vpop.f32.mrf.mxu2  ;;  %v612_v45 = vpop.f32.mrf.mxu3  ;;  %v459_v50 = vadd.f32 %v1523_v35, %v1511_v48 }
  0xc2   : > { %v570_v59 = vadd.f32 %v554_v44, %v456_v55 }
  0xc4   : > { %v1525_v52 = vpop.f32.mrf.mxu0  ;;  %v628_v13 = vadd.f32 %v612_v45, %v570_v59 }
  0xc8   : > { %v1531_v9 = vpop.f32.mrf.mxu1 }
  0xc9   : > { %v1527_v43 = vpop.f32.mrf.mxu2  ;;  %v1529_v60 = vpop.f32.mrf.mxu3  ;;  %v461_v15 = vadd.f32 %v1531_v9, %v1517_v51 }
  0xcc   : > { %v1533_v10 = vpop.f32.mrf.mxu0 }
  0xd0   : > { %v1539_v28 = vpop.f32.mrf.mxu1 }
  0xd1   : > { %v1535_v11 = vpop.f32.mrf.mxu2  ;;  %v1537_v17 = vpop.f32.mrf.mxu3 }
  0xd4   : > { %v1541_v32 = vpop.f32.mrf.mxu0 }
  0xd8   : > { %v1547_v53 = vpop.f32.mrf.mxu1 }
  0xd9   : > { %v1543_v62 = vpop.f32.mrf.mxu2  ;;  %v1545_v63 = vpop.f32.mrf.mxu3 }
  0xdc   : > { %v1549_v19 = vpop.f32.mrf.mxu0 }
  0xe0   : > { %v769_v14 = vpop.f32.mrf.mxu1 }
  0xe1   : > { %v1551_v6 = vpop.f32.mrf.mxu2  ;;  %v1553_v12 = vpop.f32.mrf.mxu3  ;;  %v789_v26 = vadd.f32 %v769_v14, %v683_v20  ;;  %v571_v20 = vadd.f32 %v1527_v43, %v459_v50 }
  0xe4   : > { %v949_v25 = vpop.f32.mrf.mxu0 }
  0xe8   : > { %v771_v22 = vpop.f32.mrf.mxu1 }
  0xe9   : > { %v827_v27 = vpop.f32.mrf.mxu2  ;;  %v885_v7 = vpop.f32.mrf.mxu3  ;;  %v790_v41 = vadd.f32 %v771_v22, %v684_v38 }
  0xea   : > { %v847_v21 = vadd.f32 %v827_v27, %v789_v26  ;;  %v686_v26 = vadd.f32 %v1521_v8, %v628_v13 }
  0xec   : > { %v905_v30 = vadd.f32 %v885_v7, %v847_v21  ;;  %v951_v34 = vpop.f32.mrf.mxu0  ;;  %v629_v21 = vadd.f32 %v1529_v60, %v571_v20 }
  0xee   : > { %v969_v37 = vadd.f32 %v949_v25, %v905_v30  ;;  %v687_v36 = vadd.f32 %v1525_v52, %v629_v21 }
  0xf0   : > { %v981_v40 = vadd.f32 %v1558_v31, %v969_v37  ;;  %v774_v39 = vpop.f32.mrf.mxu1 }
  0xf1   : > { %v829_v46 = vpop.f32.mrf.mxu2  ;;  %v887_v47 = vpop.f32.mrf.mxu3  ;;  %v791_v4 = vadd.f32 %v774_v39, %v685_v1 }
  0xf2   : > { %v989_v42 = vmax.f32 %v981_v40, 0.0  ;;  %v848_v54 = vadd.f32 %v829_v46, %v790_v41 }
  0xf4   : > { %v997_v56 = vpack.c.bf16 %v989_v42, %v989_v42  ;;  %v906_v57 = vadd.f32 %v887_v47, %v848_v54  ;;  %v954_v58 = vpop.f32.mrf.mxu0 }
  0xf6   : > { %1006 = vst.msk [vmem:[%s1565_s13] sm:$0xf] %vm1005_vm4, %v997_v56  ;;  %v970_v0 = vadd.f32 %v951_v34, %v906_v57  ;;  %v572_v34 = vadd.f32 %v1535_v11, %v461_v15  ;;  %v464_v11 = vadd.f32 %v1539_v28, %v1513_v49 }
  0xf8   : > { %v982_v3 = vadd.f32 %v1558_v31, %v970_v0  ;;  %v776_v25 = vpop.f32.mrf.mxu1  ;;  %v630_v46 = vadd.f32 %v1537_v17, %v572_v34  ;;  %v573_v54 = vadd.f32 %v1543_v62, %v464_v11  ;;  %v466_v62 = vadd.f32 %v1547_v53, %v1519_v23 }
  0xf9   : > { %v832_v18 = vpop.f32.mrf.mxu2  ;;  %v890_v61 = vpop.f32.mrf.mxu3  ;;  %v792_v45 = vadd.f32 %v776_v25, %v686_v26 }
  0xfa   : > { %v990_v14 = vmax.f32 %v982_v3, 0.0  ;;  %v849_v24 = vadd.f32 %v832_v18, %v791_v4  ;;  %v688_v39 = vadd.f32 %v1533_v10, %v630_v46  ;;  %v631_v59 = vadd.f32 %v1545_v63, %v573_v54 }
  0xfb   : > { %v574_v4 = vadd.f32 %v1551_v6, %v466_v62 }
  0xfc   : > { %v998_v5 = vpack.c.bf16 %v990_v14, %v990_v14  ;;  %v907_v16 = vadd.f32 %v890_v61, %v849_v24  ;;  %v956_v44 = vpop.f32.mrf.mxu0  ;;  %v689_v18 = vadd.f32 %v1541_v32, %v631_v59 }
  0xfd   : > { %v632_v24 = vadd.f32 %v1553_v12, %v574_v4 }
  0xfe   : > { %1007 = vst.msk [vmem:[%s1565_s13 + $0x4] sm:$0xf] %vm1005_vm4, %v998_v5  ;;  %v971_v2 = vadd.f32 %v954_v58, %v907_v16 }
  0xff   : > { %v690_v32 = vadd.f32 %v1549_v19, %v632_v24 }
 0x100   : > { %v983_v27 = vadd.f32 %v1558_v31, %v971_v2  ;;  %v779_v35 = vpop.f32.mrf.mxu1 }
 0x101   : > { %v834_v7 = vpop.f32.mrf.mxu2  ;;  %v892_v29 = vpop.f32.mrf.mxu3  ;;  %v793_v60 = vadd.f32 %v779_v35, %v687_v36 }
 0x102   : > { %v991_v22 = vmax.f32 %v983_v27, 0.0  ;;  %v850_v48 = vadd.f32 %v834_v7, %v792_v45 }
 0x104   : > { %v999_v43 = vpack.c.bf16 %v991_v22, %v991_v22  ;;  %v908_v30 = vadd.f32 %v892_v29, %v850_v48  ;;  %v959_v37 = vpop.f32.mrf.mxu0 }
 0x106   : > { %1008 = vst.msk [vmem:[%s1565_s13 + $0x8] sm:$0xf] %vm1005_vm4, %v999_v43  ;;  %v972_v8 = vadd.f32 %v956_v44, %v908_v30 }
 0x108   : > { %v984_v38 = vadd.f32 %v1558_v31, %v972_v8  ;;  %v781_v9 = vpop.f32.mrf.mxu1 }
 0x109   : > { %v837_v40 = vpop.f32.mrf.mxu2  ;;  %v895_v41 = vpop.f32.mrf.mxu3  ;;  %v794_v56 = vadd.f32 %v781_v9, %v688_v39 }
 0x10a   : > { %v992_v47 = vmax.f32 %v984_v38, 0.0  ;;  %v851_v51 = vadd.f32 %v837_v40, %v793_v60 }
 0x10c   : > { %v1000_v33 = vpack.c.bf16 %v992_v47, %v992_v47  ;;  %v909_v42 = vadd.f32 %v895_v41, %v851_v51  ;;  %v961_v17 = vpop.f32.mrf.mxu0 }
 0x10e   : > { %1009 = vst.msk [vmem:[%s1565_s13 + $0xc] sm:$0xf] %vm1005_vm4, %v1000_v33  ;;  %v973_v52 = vadd.f32 %v959_v37, %v909_v42 }
 0x110   : > { %v985_v55 = vadd.f32 %v1558_v31, %v973_v52  ;;  %v784_v28 = vpop.f32.mrf.mxu1 }
 0x111   : > { %v839_v57 = vpop.f32.mrf.mxu2  ;;  %v897_v58 = vpop.f32.mrf.mxu3  ;;  %v795_v13 = vadd.f32 %v784_v28, %v689_v18 }
 0x112   : > { %v993_v0 = vmax.f32 %v985_v55, 0.0  ;;  %v852_v49 = vadd.f32 %v839_v57, %v794_v56 }
 0x114   : > { %v1001_v1 = vpack.c.bf16 %v993_v0, %v993_v0  ;;  %v910_v3 = vadd.f32 %v897_v58, %v852_v49  ;;  %v964_v23 = vpop.f32.mrf.mxu0 }
 0x116   : > { %1010 = vst.msk [vmem:[%s1565_s13 + $0x10] sm:$0xf] %vm1005_vm4, %v1001_v1  ;;  %v974_v10 = vadd.f32 %v961_v17, %v910_v3 }
 0x118   : > { %v986_v61 = vadd.f32 %v1558_v31, %v974_v10  ;;  %v786_v16 = vpop.f32.mrf.mxu1 }
 0x119   : > { %v842_v63 = vpop.f32.mrf.mxu2  ;;  %v900_v14 = vpop.f32.mrf.mxu3  ;;  %v796_v20 = vadd.f32 %v786_v16, %v690_v32 }
 0x11a   : > { %v994_v25 = vmax.f32 %v986_v61, 0.0  ;;  %v853_v50 = vadd.f32 %v842_v63, %v795_v13 }
 0x11c   : > { %v1002_v53 = vpack.c.bf16 %v994_v25, %v994_v25  ;;  %v911_v5 = vadd.f32 %v900_v14, %v853_v50  ;;  %v966_v29 = vpop.f32.mrf.mxu0 }
 0x11e   : > { %1011 = vst.msk [vmem:[%s1565_s13 + $0x14] sm:$0xf] %vm1005_vm4, %v1002_v53  ;;  %v975_v6 = vadd.f32 %v964_v23, %v911_v5 }
 0x120   : > { %v987_v44 = vadd.f32 %v1558_v31, %v975_v6 }
 0x121   : > { %v844_v2 = vpop.f32.mrf.mxu2  ;;  %v902_v12 = vpop.f32.mrf.mxu3 }
 0x122   : > { %v995_v26 = vmax.f32 %v987_v44, 0.0  ;;  %v854_v27 = vadd.f32 %v844_v2, %v796_v20 }
 0x124   : > { %v1003_v45 = vpack.c.bf16 %v995_v26, %v995_v26  ;;  %v912_v7 = vadd.f32 %v902_v12, %v854_v27 }
 0x126   : > { %1012 = vst.msk [vmem:[%s1565_s13 + $0x18] sm:$0xf] %vm1005_vm4, %v1003_v45  ;;  %v976_v21 = vadd.f32 %v966_v29, %v912_v7 }
 0x128   : > { %v988_v22 = vadd.f32 %v1558_v31, %v976_v21 }
 0x12a   : > { %v996_v48 = vmax.f32 %v988_v22, 0.0 }
 0x12c   : > { %v1004_v35 = vpack.c.bf16 %v996_v48, %v996_v48 }
 0x12e   : > { %1013 = vst.msk [vmem:[%s1565_s13 + $0x1c] sm:$0xf] %vm1005_vm4, %v1004_v35 }
 0x12f PF: > { %s16_s21 = sadd.s32 1, %s1183_s21  }
 0x130   : > { %p13_p4 = scmp.ge.s32.totalorder %s16_s21, 4  }
 0x132   :  { %15 = sbr.rel (!%p13_p4) target bundleno = 1 (0x1), region = 91 }

// kernel: classifier_forward.5
= control target key start
LH: loop header
LB: loop body
LE: loop exit
PB: predicated region body
PF: predicated region fallthrough
CT: control target
= control target key end

     0   :  { %s1415_s1 = inlined_call_operand.vmem [shape: bf16[128,512], index: 1, kind: input, shape index: {}]   ;;  %s1416_s0 = inlined_call_operand.vmem [shape: f32[2,128], index: 0, kind: input, shape index: {}]   ;;  %s1417_s3 = inlined_call_operand.vmem [shape: bf16[512,128], index: 3, kind: input, shape index: {}]   ;;  %s1418_s4 = inlined_call_operand.vmem [shape: f32[1,128], index: 4, kind: input, shape index: {}]   ;;  %s1419_s5 = inlined_call_operand.vmem [shape: bf16[128,128], index: 5, kind: input, shape index: {}]   ;;  %s1420_s2 = inlined_call_operand.vmem [shape: f32[1,512], index: 2, kind: input, shape index: {}]   ;;  %s1421_s6 = inlined_call_operand.vmem [shape: f32[1,128], index: 6, kind: input, shape index: {}]   ;;  %s1422_s7 = inlined_call_operand.vmem [shape: f32[2,128], index: 7, kind: output, shape index: {}]  }
   0x1   :  { %v800_v0 = vld [vmem:[%s1415_s1 + $0xe0] sm:$0xf]  ;;  %v1004_v1 = vld [vmem:[%s1415_s1 + $0xec] sm:$0xf0]  ;;  %v808_v2 = vld [vmem:[%s1415_s1 + $0xe8] sm:$0xf] }
   0x2   :  { %v801_v3 = vor.u32 %v1004_v1, %v800_v0  ;;  %v1005_v4 = vld [vmem:[%s1415_s1 + $0xf4] sm:$0xf0]  ;;  %v1003_v5 = vld [vmem:[%s1415_s1 + $0xec] sm:$0xf]  ;;  %v810_v6 = vld [vmem:[%s1415_s1 + $0xf8] sm:$0xf0] }
   0x3   :  { %v809_v7 = vor.u32 %v1005_v4, %v808_v2  ;;  %v813_v8 = vor.u32 %v1003_v5, %v810_v6  ;;  %v1002_v9 = vld [vmem:[%s1415_s1 + $0xe4] sm:$0xf]  ;;  %v802_v10 = vld [vmem:[%s1415_s1 + $0xf0] sm:$0xf0]  ;;  %v784_v11 = vld [vmem:[%s1415_s1 + $0xc0] sm:$0xf] }
   0x4   :  { %230 = vmatpush.bf16.msra.mxu0 %v801_v3  ;;  %v805_v12 = vor.u32 %v1002_v9, %v802_v10  ;;  %v1000_v13 = vld [vmem:[%s1415_s1 + $0xcc] sm:$0xf0]  ;;  %v792_v14 = vld [vmem:[%s1415_s1 + $0xc8] sm:$0xf]  ;;  %v1001_v15 = vld [vmem:[%s1415_s1 + $0xd4] sm:$0xf0] }
   0x5   :  { %256 = vmatpush.bf16.msra.mxu2 %v809_v7  ;;  %269 = vmatpush.bf16.msra.mxu3 %v813_v8  ;;  %v785_v16 = vor.u32 %v1000_v13, %v784_v11  ;;  %v793_v17 = vor.u32 %v1001_v15, %v792_v14  ;;  %v999_v18 = vld [vmem:[%s1415_s1 + $0xcc] sm:$0xf]  ;;  %v794_v19 = vld [vmem:[%s1415_s1 + $0xd8] sm:$0xf0]  ;;  %v998_v20 = vld [vmem:[%s1415_s1 + $0xc4] sm:$0xf] }
   0x6   :  { %243 = vmatpush.bf16.msra.mxu1 %v805_v12  ;;  %v797_v21 = vor.u32 %v999_v18, %v794_v19  ;;  %v786_v22 = vld [vmem:[%s1415_s1 + $0xd0] sm:$0xf0]  ;;  %v768_v23 = vld [vmem:[%s1415_s1 + $0xa0] sm:$0xf]  ;;  %v996_v24 = vld [vmem:[%s1415_s1 + $0xac] sm:$0xf0] }
   0x7   :  { %v789_v25 = vor.u32 %v998_v20, %v786_v22  ;;  %v776_v26 = vld [vmem:[%s1415_s1 + $0xa8] sm:$0xf]  ;;  %v997_v27 = vld [vmem:[%s1415_s1 + $0xb4] sm:$0xf0]  ;;  %v995_v28 = vld [vmem:[%s1415_s1 + $0xac] sm:$0xf]  ;;  %v769_v29 = vor.u32 %v996_v24, %v768_v23 }
   0x8   :  { %231 = vmatpush.bf16.msra.mxu0 %v785_v16  ;;  %v778_v30 = vld [vmem:[%s1415_s1 + $0xb8] sm:$0xf0]  ;;  %v994_v31 = vld [vmem:[%s1415_s1 + $0xa4] sm:$0xf]  ;;  %v770_v32 = vld [vmem:[%s1415_s1 + $0xb0] sm:$0xf0]  ;;  %v777_v33 = vor.u32 %v997_v27, %v776_v26 }
   0x9   :  { %257 = vmatpush.bf16.msra.mxu2 %v793_v17  ;;  %270 = vmatpush.bf16.msra.mxu3 %v797_v21  ;;  %v781_v34 = vor.u32 %v995_v28, %v778_v30  ;;  %v752_v35 = vld [vmem:[%s1415_s1 + $0x80] sm:$0xf]  ;;  %v992_v36 = vld [vmem:[%s1415_s1 + $0x8c] sm:$0xf0]  ;;  %v760_v37 = vld [vmem:[%s1415_s1 + $0x88] sm:$0xf]  ;;  %v773_v38 = vor.u32 %v994_v31, %v770_v32 }
   0xa   :  { %244 = vmatpush.bf16.msra.mxu1 %v789_v25  ;;  %v993_v39 = vld [vmem:[%s1415_s1 + $0x94] sm:$0xf0]  ;;  %v991_v40 = vld [vmem:[%s1415_s1 + $0x8c] sm:$0xf]  ;;  %v762_v41 = vld [vmem:[%s1415_s1 + $0x98] sm:$0xf0]  ;;  %v753_v44 = vor.u32 %v992_v36, %v752_v35 }
   0xb   :  { %v990_v42 = vld [vmem:[%s1415_s1 + $0x84] sm:$0xf]  ;;  %v754_v43 = vld [vmem:[%s1415_s1 + $0x90] sm:$0xf0]  ;;  %v761_v45 = vor.u32 %v993_v39, %v760_v37  ;;  %v765_v46 = vor.u32 %v991_v40, %v762_v41  ;;  %v736_v47 = vld [vmem:[%s1415_s1 + $0x60] sm:$0xf] }
   0xc   :  { %232 = vmatpush.bf16.msra.mxu0 %v769_v29  ;;  %v988_v48 = vld [vmem:[%s1415_s1 + $0x6c] sm:$0xf0]  ;;  %v744_v49 = vld [vmem:[%s1415_s1 + $0x68] sm:$0xf]  ;;  %v757_v50 = vor.u32 %v990_v42, %v754_v43  ;;  %v989_v51 = vld [vmem:[%s1415_s1 + $0x74] sm:$0xf0] }
   0xd   :  { %258 = vmatpush.bf16.msra.mxu2 %v777_v33  ;;  %271 = vmatpush.bf16.msra.mxu3 %v781_v34  ;;  %v987_v52 = vld [vmem:[%s1415_s1 + $0x6c] sm:$0xf]  ;;  %v746_v53 = vld [vmem:[%s1415_s1 + $0x78] sm:$0xf0]  ;;  %v986_v54 = vld [vmem:[%s1415_s1 + $0x64] sm:$0xf]  ;;  %v737_v56 = vor.u32 %v988_v48, %v736_v47  ;;  %v745_v57 = vor.u32 %v989_v51, %v744_v49 }
   0xe   :  { %245 = vmatpush.bf16.msra.mxu1 %v773_v38  ;;  %v738_v55 = vld [vmem:[%s1415_s1 + $0x70] sm:$0xf0]  ;;  %v749_v58 = vor.u32 %v987_v52, %v746_v53  ;;  %v720_v59 = vld [vmem:[%s1415_s1 + $0x40] sm:$0xf]  ;;  %v984_v60 = vld [vmem:[%s1415_s1 + $0x4c] sm:$0xf0] }
   0xf   :  { %v728_v61 = vld [vmem:[%s1415_s1 + $0x48] sm:$0xf]  ;;  %v741_v62 = vor.u32 %v986_v54, %v738_v55  ;;  %v985_v63 = vld [vmem:[%s1415_s1 + $0x54] sm:$0xf0]  ;;  %v983_v0 = vld [vmem:[%s1415_s1 + $0x4c] sm:$0xf]  ;;  %v721_v4 = vor.u32 %v984_v60, %v720_v59 }
  0x10   :  { %233 = vmatpush.bf16.msra.mxu0 %v753_v44  ;;  %v730_v1 = vld [vmem:[%s1415_s1 + $0x58] sm:$0xf0]  ;;  %v982_v2 = vld [vmem:[%s1415_s1 + $0x44] sm:$0xf]  ;;  %v722_v3 = vld [vmem:[%s1415_s1 + $0x50] sm:$0xf0]  ;;  %v729_v5 = vor.u32 %v985_v63, %v728_v61 }
  0x11   :  { %259 = vmatpush.bf16.msra.mxu2 %v761_v45  ;;  %272 = vmatpush.bf16.msra.mxu3 %v765_v46  ;;  %v733_v6 = vor.u32 %v983_v0, %v730_v1  ;;  %v704_v7 = vld [vmem:[%s1415_s1 + $0x20] sm:$0xf]  ;;  %v980_v8 = vld [vmem:[%s1415_s1 + $0x2c] sm:$0xf0]  ;;  %v712_v9 = vld [vmem:[%s1415_s1 + $0x28] sm:$0xf]  ;;  %v725_v10 = vor.u32 %v982_v2, %v722_v3 }
  0x12   :  { %246 = vmatpush.bf16.msra.mxu1 %v757_v50  ;;  %v981_v11 = vld [vmem:[%s1415_s1 + $0x34] sm:$0xf0]  ;;  %v979_v12 = vld [vmem:[%s1415_s1 + $0x2c] sm:$0xf]  ;;  %v714_v13 = vld [vmem:[%s1415_s1 + $0x38] sm:$0xf0]  ;;  %v705_v16 = vor.u32 %v980_v8, %v704_v7 }
  0x13   :  { %v978_v14 = vld [vmem:[%s1415_s1 + $0x24] sm:$0xf]  ;;  %v706_v15 = vld [vmem:[%s1415_s1 + $0x30] sm:$0xf0]  ;;  %v713_v17 = vor.u32 %v981_v11, %v712_v9  ;;  %v717_v18 = vor.u32 %v979_v12, %v714_v13  ;;  %v688_v19 = vld [vmem:[%s1415_s1] sm:$0xf] }
  0x14   :  { %234 = vmatpush.bf16.msra.mxu0 %v737_v56  ;;  %v976_v20 = vld [vmem:[%s1415_s1 + $0xc] sm:$0xf0]  ;;  %v696_v21 = vld [vmem:[%s1415_s1 + $0x8] sm:$0xf]  ;;  %v709_v22 = vor.u32 %v978_v14, %v706_v15  ;;  %v977_v23 = vld [vmem:[%s1415_s1 + $0x14] sm:$0xf0] }
  0x15   :  { %260 = vmatpush.bf16.msra.mxu2 %v745_v57  ;;  %273 = vmatpush.bf16.msra.mxu3 %v749_v58  ;;  %v975_v24 = vld [vmem:[%s1415_s1 + $0xc] sm:$0xf]  ;;  %v698_v25 = vld [vmem:[%s1415_s1 + $0x18] sm:$0xf0]  ;;  %v974_v26 = vld [vmem:[%s1415_s1 + $0x4] sm:$0xf]  ;;  %v689_v28 = vor.u32 %v976_v20, %v688_v19  ;;  %v697_v30 = vor.u32 %v977_v23, %v696_v21 }
  0x16   :  { %247 = vmatpush.bf16.msra.mxu1 %v741_v62  ;;  %v690_v27 = vld [vmem:[%s1415_s1 + $0x10] sm:$0xf0]  ;;  %v26_v29 = vld [vmem:[%s1416_s0] sm:$0x3]  ;;  %v701_v31 = vor.u32 %v975_v24, %v698_v25  ;;  %v1013_v33 = vld [vmem:[%s1417_s3 + $0x38] sm:$0xff] }
  0x17   :  { %v693_v32 = vor.u32 %v974_v26, %v690_v27  ;;  %v27_v34 = vpack.c.bf16 %v26_v29, %v26_v29  ;;  %v1021_v35 = vld [vmem:[%s1417_s3 + $0x78] sm:$0xff]  ;;  %v1012_v37 = vld [vmem:[%s1417_s3 + $0x30] sm:$0xff]  ;;  %v1011_v41 = vld [vmem:[%s1417_s3 + $0x28] sm:$0xff] }
  0x18   :  { %235 = vmatpush.bf16.msra.mxu0 %v721_v4  ;;  %v1029_v36 = vld [vmem:[%s1417_s3 + $0xb8] sm:$0xff]  ;;  %v1020_v39 = vld [vmem:[%s1417_s3 + $0x70] sm:$0xff]  ;;  %v1019_v43 = vld [vmem:[%s1417_s3 + $0x68] sm:$0xff] }
  0x19   :  { %261 = vmatpush.bf16.msra.mxu2 %v729_v5  ;;  %274 = vmatpush.bf16.msra.mxu3 %v733_v6  ;;  %v1037_v38 = vld [vmem:[%s1417_s3 + $0xf8] sm:$0xff]  ;;  %v1028_v40 = vld [vmem:[%s1417_s3 + $0xb0] sm:$0xff]  ;;  %v1027_v44 = vld [vmem:[%s1417_s3 + $0xa8] sm:$0xff] }
  0x1a   :  { %248 = vmatpush.bf16.msra.mxu1 %v725_v10  ;;  %v1036_v42 = vld [vmem:[%s1417_s3 + $0xf0] sm:$0xff]  ;;  %v1010_v45 = vld [vmem:[%s1417_s3 + $0x20] sm:$0xff]  ;;  %v1035_v46 = vld [vmem:[%s1417_s3 + $0xe8] sm:$0xff] }
  0x1b   :  { %v1018_v47 = vld [vmem:[%s1417_s3 + $0x60] sm:$0xff]  ;;  %v1009_v49 = vld [vmem:[%s1417_s3 + $0x18] sm:$0xff]  ;;  %v1008_v53 = vld [vmem:[%s1417_s3 + $0x10] sm:$0xff] }
  0x1c   :  { %236 = vmatpush.bf16.msra.mxu0 %v705_v16  ;;  %v1026_v48 = vld [vmem:[%s1417_s3 + $0xa0] sm:$0xff]  ;;  %v1017_v51 = vld [vmem:[%s1417_s3 + $0x58] sm:$0xff]  ;;  %v1016_v55 = vld [vmem:[%s1417_s3 + $0x50] sm:$0xff] }
  0x1d   :  { %262 = vmatpush.bf16.msra.mxu2 %v713_v17  ;;  %275 = vmatpush.bf16.msra.mxu3 %v717_v18  ;;  %v1034_v50 = vld [vmem:[%s1417_s3 + $0xe0] sm:$0xff]  ;;  %v1025_v52 = vld [vmem:[%s1417_s3 + $0x98] sm:$0xff]  ;;  %v1007_v56 = vld [vmem:[%s1417_s3 + $0x8] sm:$0xff] }
  0x1e   :  { %249 = vmatpush.bf16.msra.mxu1 %v709_v22  ;;  %v1033_v54 = vld [vmem:[%s1417_s3 + $0xd8] sm:$0xff]  ;;  %v1015_v57 = vld [vmem:[%s1417_s3 + $0x48] sm:$0xff]  ;;  %v1024_v58 = vld [vmem:[%s1417_s3 + $0x90] sm:$0xff] }
  0x1f   :  { %v1032_v59 = vld [vmem:[%s1417_s3 + $0xd0] sm:$0xff]  ;;  %v1006_v60 = vld [vmem:[%s1417_s3] sm:$0xff]  ;;  %v1023_v62 = vld [vmem:[%s1417_s3 + $0x88] sm:$0xff] }
  0x20   :  { %237 = vmatpush.bf16.msra.mxu0 %v689_v28  ;;  %v1014_v61 = vld [vmem:[%s1417_s3 + $0x40] sm:$0xff]  ;;  %v1031_v63 = vld [vmem:[%s1417_s3 + $0xc8] sm:$0xff]  ;;  %v1045_v2 = vld [vmem:[%s1419_s5 + $0x38] sm:$0xff] }
  0x21   :  { %263 = vmatpush.bf16.msra.mxu2 %v697_v30  ;;  %276 = vmatpush.bf16.msra.mxu3 %v701_v31  ;;  %v1022_v0 = vld [vmem:[%s1417_s3 + $0x80] sm:$0xff]  ;;  %v1044_v3 = vld [vmem:[%s1419_s5 + $0x30] sm:$0xff]  ;;  %v1043_v4 = vld [vmem:[%s1419_s5 + $0x28] sm:$0xff] }
  0x22   :  { %250 = vmatpush.bf16.msra.mxu1 %v693_v32  ;;  %v1030_v1 = vld [vmem:[%s1417_s3 + $0xc0] sm:$0xff]  ;;  %v1041_v27 = vld [vmem:[%s1419_s5 + $0x18] sm:$0xff]  ;;  %v1040_v28 = vld [vmem:[%s1419_s5 + $0x10] sm:$0xff] }
  0x23   :  { %238 = vmatmul.bf16.vlgmr.msra.gmra.mxu0 %v27_v34  ;;  %v60_v5 = vld [vmem:[%s1420_s2] sm:$0xf]  ;;  %v1039_v29 = vld [vmem:[%s1419_s5 + $0x8] sm:$0xff] }
  0x24   :  { %546 = vmatpush.bf16.msrb.mxu0 %v1013_v33  ;;  %264 = vmatmul.bf16.vlgmr.msra.gmra.mxu2 %v27_v34  ;;  %v62_v6 = vperm.slane %v60_v5, 0  ;;  %v63_v7 = vperm.slane %v60_v5, 1  ;;  %v64_v13 = vperm.slane %v60_v5, 2  ;;  %v65_v14 = vperm.slane %v60_v5, 3  ;;  %v1042_v26 = vld [vmem:[%s1419_s5 + $0x20] sm:$0xff] }
  0x25   :  { %277 = vmatmul.bf16.vlgmr.msra.gmra.mxu3 %v27_v34  ;;  %251 = vmatmul.bf16.vlgmr.msra.gmra.mxu1 %v27_v34  ;;  %v1038_v30 = vld [vmem:[%s1419_s5] sm:$0xff] }
  0x26   :  { %559 = vmatpush.bf16.msrb.mxu1 %v1021_v35  ;;  %572 = vmatpush.bf16.msrb.mxu2 %v1029_v36  ;;  %v1046_v32 = vld [vmem:[%s1418_s4] ss:$0 sm:$0xff] }
  0x27   :  { %585 = vmatpush.bf16.msrb.mxu3 %v1037_v38 }
  0x28   :  { %547 = vmatpush.bf16.msrb.mxu0 %v1012_v37 }
  0x2a   :  { %560 = vmatpush.bf16.msrb.mxu1 %v1020_v39  ;;  %573 = vmatpush.bf16.msrb.mxu2 %v1028_v40 }
  0x2b   :  { %586 = vmatpush.bf16.msrb.mxu3 %v1036_v42 }
  0x2c   :  { %548 = vmatpush.bf16.msrb.mxu0 %v1011_v41 }
  0x2e   :  { %561 = vmatpush.bf16.msrb.mxu1 %v1019_v43  ;;  %574 = vmatpush.bf16.msrb.mxu2 %v1027_v44 }
  0x2f   :  { %587 = vmatpush.bf16.msrb.mxu3 %v1035_v46  ;;  %v1047_v46 = vld [vmem:[%s1421_s6] ss:$0 sm:$0xff] }
  0x30   :  { %549 = vmatpush.bf16.msrb.mxu0 %v1010_v45 }
  0x32   :  { %562 = vmatpush.bf16.msrb.mxu1 %v1018_v47  ;;  %575 = vmatpush.bf16.msrb.mxu2 %v1026_v48 }
  0x33   :  { %588 = vmatpush.bf16.msrb.mxu3 %v1034_v50 }
  0x34   :  { %550 = vmatpush.bf16.msrb.mxu0 %v1009_v49 }
  0x36   :  { %563 = vmatpush.bf16.msrb.mxu1 %v1017_v51  ;;  %576 = vmatpush.bf16.msrb.mxu2 %v1025_v52 }
  0x37   :  { %589 = vmatpush.bf16.msrb.mxu3 %v1033_v54 }
  0x38   :  { %551 = vmatpush.bf16.msrb.mxu0 %v1008_v53 }
  0x3a   :  { %564 = vmatpush.bf16.msrb.mxu1 %v1016_v55  ;;  %577 = vmatpush.bf16.msrb.mxu2 %v1024_v58 }
  0x3b   :  { %590 = vmatpush.bf16.msrb.mxu3 %v1032_v59 }
  0x3c   :  { %552 = vmatpush.bf16.msrb.mxu0 %v1007_v56 }
  0x3e   :  { %565 = vmatpush.bf16.msrb.mxu1 %v1015_v57  ;;  %578 = vmatpush.bf16.msrb.mxu2 %v1023_v62 }
  0x3f   :  { %591 = vmatpush.bf16.msrb.mxu3 %v1031_v63 }
  0x40   :  { %553 = vmatpush.bf16.msrb.mxu0 %v1006_v60 }
  0x42   :  { %566 = vmatpush.bf16.msrb.mxu1 %v1014_v61  ;;  %579 = vmatpush.bf16.msrb.mxu2 %v1022_v0 }
  0x43   :  { %592 = vmatpush.bf16.msrb.mxu3 %v1030_v1 }
  0x44   :  { %668 = vmatpush.bf16.msra.mxu0 %v1045_v2 }
  0x48   :  { %669 = vmatpush.bf16.msra.mxu0 %v1044_v3 }
  0x4c   :  { %670 = vmatpush.bf16.msra.mxu0 %v1043_v4 }
  0x50   :  { %671 = vmatpush.bf16.msra.mxu0 %v1042_v26 }
  0x54   :  { %672 = vmatpush.bf16.msra.mxu0 %v1041_v27 }
  0x58   :  { %673 = vmatpush.bf16.msra.mxu0 %v1040_v28 }
  0x5c   :  { %674 = vmatpush.bf16.msra.mxu0 %v1039_v29 }
  0x60   :  { %675 = vmatpush.bf16.msra.mxu0 %v1038_v30 }
  0xa0   :  { %v239_v8 = vpop.f32.mrf.mxu0 }
  0xa1   :  { %v240_v9 = vadd.f32 %v239_v8, %v62_v6 }
  0xa2   :  { %v252_v10 = vpop.f32.mrf.mxu1 }
  0xa3   :  { %v282_v11 = vpack.c.bf16 %v240_v9, %v240_v9  ;;  %v253_v12 = vadd.f32 %v252_v10, %v63_v7 }
  0xa5   :  { %v283_v15 = vpack.c.bf16 %v253_v12, %v253_v12  ;;  %554 = vmatmul.bf16.vlgmr.msrb.gmra.mxu0 %v282_v11 }
  0xa7   :  { %v265_v16 = vpop.f32.mrf.mxu2  ;;  %567 = vmatmul.bf16.vlgmr.msrb.gmra.mxu1 %v283_v15 }
  0xa8   :  { %v278_v17 = vpop.f32.mrf.mxu3  ;;  %v266_v18 = vadd.f32 %v265_v16, %v64_v13  ;;  %v241_v20 = vpop.f32.mrf.mxu0 }
  0xa9   :  { %v279_v19 = vadd.f32 %v278_v17, %v65_v14 }
  0xaa   :  { %v284_v21 = vpack.c.bf16 %v266_v18, %v266_v18  ;;  %v254_v23 = vpop.f32.mrf.mxu1 }
  0xab   :  { %v285_v22 = vpack.c.bf16 %v279_v19, %v279_v19 }
  0xac   :  { %580 = vmatmul.bf16.vlgmr.msrb.gmra.mxu2 %v284_v21 }
  0xad   :  { %593 = vmatmul.bf16.vlgmr.msrb.gmra.mxu3 %v285_v22 }
  0xaf   :  { %v267_v24 = vpop.f32.mrf.mxu2 }
  0xb0   :  { %v280_v25 = vpop.f32.mrf.mxu3 }
 0x122   :  { %v555_v31 = vpop.f32.mrf.mxu0 }
 0x123   :  { %v556_v34 = vadd.f32 %v1046_v32, %v555_v31 }
 0x124   :  { %v568_v33 = vpop.f32.mrf.mxu1 }
 0x125   :  { %v569_v36 = vadd.f32 %v568_v33, %v556_v34 }
 0x12a   :  { %v557_v35 = vpop.f32.mrf.mxu0 }
 0x12c   :  { %v570_v37 = vpop.f32.mrf.mxu1 }
 0x12f   :  { %v581_v38 = vpop.f32.mrf.mxu2 }
 0x130   :  { %v594_v39 = vpop.f32.mrf.mxu3  ;;  %v582_v40 = vadd.f32 %v581_v38, %v569_v36 }
 0x132   :  { %v595_v41 = vadd.f32 %v594_v39, %v582_v40 }
 0x134   :  { %v598_v42 = vmax.f32 %v595_v41, 0.0 }
 0x136   :  { %v599_v43 = vpack.c.bf16 %v598_v42, %v598_v42 }
 0x137   :  { %v583_v44 = vpop.f32.mrf.mxu2 }
 0x138   :  { %v596_v45 = vpop.f32.mrf.mxu3  ;;  %676 = vmatmul.bf16.vlgmr.msra.gmra.mxu0 %v599_v43 }
 0x1b5   :  { %v677_v47 = vpop.f32.mrf.mxu0 }
 0x1b6   :  { %v678_v48 = vadd.f32 %v1047_v46, %v677_v47 }
 0x1b8   :  { %681 = vst [vmem:[%s1422_s7] sm:$0x3] %v678_v48 }
 0x1bd   :  { %v679_v49 = vpop.f32.mrf.mxu0 }

// kernel: classifier_forward.4
= control target key start
LH: loop header
LB: loop body
LE: loop exit
PB: predicated region body
PF: predicated region fallthrough
CT: control target
= control target key end

     0   :  { %s1487_s21 = smov 0   ;;  %s1751_s0 = inlined_call_operand.vmem [shape: bf16[2,5,5,64], index: 0, kind: input, shape index: {}]   ;;  %s1752_s1 = inlined_call_operand.vmem [shape: bf16[2,5,5,64], index: 1, kind: input, shape index: {}]   ;;  %s1753_s2 = inlined_call_operand.vmem [shape: bf16[2,5,5,64], index: 2, kind: input, shape index: {}]   ;;  %s1754_s3 = inlined_call_operand.vmem [shape: bf16[2,5,5,64], index: 3, kind: input, shape index: {}]   ;;  %s1755_s4 = inlined_call_operand.vmem [shape: bf16[9,64,128], index: 4, kind: input, shape index: {}]   ;;  %s1756_s5 = inlined_call_operand.vmem [shape: f32[1,128], index: 5, kind: input, shape index: {}]   ;;  %s1757_s6 = inlined_call_operand.vmem [shape: f32[2,1,128], index: 6, kind: output, shape index: {}]  }
   0x1 LB: > { %s1170_s22 = sadd.s32 4294967295, %s1450_s21   ;;  %p1174_p0 = scmp.ge.s32.totalorder %s1450_s21, 1  ;;  %s1450_s21 = sphi %s1487_s21, %s16_s21  }
   0x2   : > { %p242_p1 = scmp.lt.s32.totalorder %s1450_s21, 3 }
   0x4   : > { %p243_p2 = pnand %p1174_p0, %p242_p1 }
   0x5   : > { %p285_p3 = scmp.lt.s32.totalorder (!%p243_p2), %s1170_s22, 1 }
   0x6   : > { %246 = sbr.rel (%p243_p2) target bundleno = 272 (0x110), region = 44 }
   0xb   : > { %v1405_v0 = vld [vmem:[%s1755_s4 + $0x38] sm:$0xff]  ;;  %v1404_v3 = vld [vmem:[%s1755_s4 + $0x30] sm:$0xff]  ;;  %s1763_s22 = smov (!%p285_p3, %s1170_s22), 1  ;;  %v1403_v8 = vld [vmem:[%s1755_s4 + $0x28] sm:$0xff]  ;;  %vm457_vm0 = vcmask 1041408   ;;  %vm460_vm1 = vcmask 1043458  }
   0xc   : > { %v1409_v1 = vld [vmem:[%s1755_s4 + $0x58] sm:$0xff]  ;;  %387 = vmatpush.bf16.msra.mxu0 %v1405_v0  ;;  %v1408_v4 = vld [vmem:[%s1755_s4 + $0x50] sm:$0xff]  ;;  %s1522_s15 = smul.u32 20, %s1763_s22  ;;  %v1407_v9 = vld [vmem:[%s1755_s4 + $0x48] sm:$0xff]  ;;  %vm380_vm2 = vcmask 523264   ;;  %s307_s29 = scalar_lea.vmem %s1757_s6, %s1763_s22 }
   0xd   : > { %v1401_v2 = vld [vmem:[%s1755_s4 + $0x18] sm:$0xff]  ;;  %589 = vmatpush.bf16.msra.mxu2 %v1409_v1  ;;  %v1400_v6 = vld [vmem:[%s1755_s4 + $0x10] sm:$0xff]  ;;  %v1399_v10 = vld [vmem:[%s1755_s4 + $0x8] sm:$0xff]  ;;  %vm479_vm3 = vsmask.f32 1280 }
   0xe   : > { %v1413_v5 = vld [vmem:[%s1755_s4 + $0x78] sm:$0xff]  ;;  %439 = vmatpush.bf16.msra.mxu1 %v1401_v2  ;;  %v1412_v7 = vld [vmem:[%s1755_s4 + $0x70] sm:$0xff]  ;;  %s1534_s24 = scalar_lea.vmem %s1752_s1, %s1522_s15  ;;  %v1411_v11 = vld [vmem:[%s1755_s4 + $0x68] sm:$0xff]  ;;  %s1546_s7 = scalar_lea.vmem %s1751_s0, %s1522_s15  ;;  %vm480_vm4 = vsmask.f32 3336 }
   0xf   : > { %652 = vmatpush.bf16.msra.mxu3 %v1413_v5  ;;  %v314_v12 = vld [vmem:[%s1534_s24] sm:$0x7]  ;;  %v1550_v13 = vld [vmem:[%s1534_s24 + $0x4] sm:$0x7]  ;;  %v1553_v14 = vld [vmem:[%s1534_s24 + $0x8] sm:$0x7]  ;;  %s299_s20 = scalar_lea.vmem %s1753_s2, %s1522_s15  ;;  %s304_s30 = scalar_lea.vmem %s1754_s3, %s1522_s15 }
  0x10   : > { %388 = vmatpush.bf16.msra.mxu0 %v1404_v3  ;;  %v1402_v15 = vld [vmem:[%s1755_s4 + $0x20] sm:$0xff]  ;;  %v1559_v16 = vld [vmem:[%s1534_s24 + $0xc] sm:$0x7]  ;;  %345 = vst [vmem:[#allocation1] ss:$4 sm:$0xff] %v314_v12  ;;  %v1417_v24 = vld [vmem:[%s1755_s4 + $0x98] sm:$0xff] }
  0x11   : > { %590 = vmatpush.bf16.msra.mxu2 %v1408_v4  ;;  %v1406_v17 = vld [vmem:[%s1755_s4 + $0x40] sm:$0xff]  ;;  %348 = vst [vmem:[#allocation1 + $0x1] ss:$4 sm:$0xff] %v1550_v13  ;;  %v1570_v20 = vld [vmem:[%s1546_s7 + $0x8] sm:$0x7]  ;;  %v1416_v45 = vld [vmem:[%s1755_s4 + $0x90] sm:$0xff] }
  0x12   : > { %440 = vmatpush.bf16.msra.mxu1 %v1400_v6  ;;  %v309_v18 = vld [vmem:[%s1546_s7] sm:$0x7]  ;;  %v1567_v19 = vld [vmem:[%s1546_s7 + $0x4] sm:$0x7]  ;;  %351 = vst [vmem:[#allocation1 + $0x2] ss:$4 sm:$0xff] %v1553_v14  ;;  %vm1608_vm6 = vmor %vm479_vm3, %vm480_vm4 }
  0x13   : > { %653 = vmatpush.bf16.msra.mxu3 %v1412_v7  ;;  %v1574_v21 = vld [vmem:[%s1546_s7 + $0xc] sm:$0x7]  ;;  %v453_v22 = vrot.slane %v309_v18, 2  ;;  %v454_v23 = vrot.slane %v1567_v19, 2  ;;  %354 = vst [vmem:[#allocation1 + $0x3] ss:$4 sm:$0xff] %v1559_v16 }
  0x14   : > { %389 = vmatpush.bf16.msra.mxu0 %v1403_v8  ;;  %v455_v25 = vrot.slane %v1570_v20, 2  ;;  %v456_v26 = vrot.slane %v1574_v21, 2  ;;  %v1398_v27 = vld [vmem:[%s1755_s4] sm:$0xff]  ;;  %vm482_vm5 = vsmask.f32 5392  ;;  %v1415_v62 = vld [vmem:[%s1755_s4 + $0x88] sm:$0xff] }
  0x15   : > { %591 = vmatpush.bf16.msra.mxu2 %v1407_v9  ;;  %v459_v28 = vsel %vm457_vm0, %v309_v18, %v453_v22  ;;  %v461_v29 = vsel %vm460_vm1, %v309_v18, %v453_v22  ;;  %v465_v30 = vsel %vm457_vm0, %v1567_v19, %v454_v23  ;;  %v466_v31 = vsel %vm460_vm1, %v1567_v19, %v454_v23  ;;  %v1410_v32 = vld [vmem:[%s1755_s4 + $0x60] sm:$0xff]  ;;  %v1421_v63 = vld [vmem:[%s1755_s4 + $0xb8] sm:$0xff]  ;;  %vm483_vm7 = vmor %vm1608_vm6, %vm482_vm5 }
  0x16   : > { %441 = vmatpush.bf16.msra.mxu1 %v1399_v10  ;;  %v470_v33 = vsel %vm457_vm0, %v1570_v20, %v455_v25  ;;  %v463_v34 = vrot.slane %v461_v29, 2  ;;  %v471_v35 = vsel %vm460_vm1, %v1570_v20, %v455_v25  ;;  %v486_v36 = vshrl.u32 %v459_v28, 16  ;;  %v1420_v5 = vld [vmem:[%s1755_s4 + $0xb0] sm:$0xff]  ;;  %v1414_v12 = vld [vmem:[%s1755_s4 + $0x80] sm:$0xff]  ;;  %v1425_v29 = vld [vmem:[%s1755_s4 + $0xd8] sm:$0xff] }
  0x17   : > { %654 = vmatpush.bf16.msra.mxu3 %v1411_v11  ;;  %v468_v37 = vrot.slane %v466_v31, 2  ;;  %v476_v38 = vsel %vm460_vm1, %v1574_v21, %v456_v26  ;;  %v489_v39 = vshll.u32 %v459_v28, 16  ;;  %v499_v40 = vshrl.u32 %v465_v30, 16  ;;  %v1419_v28 = vld [vmem:[%s1755_s4 + $0xa8] sm:$0xff]  ;;  %v1424_v31 = vld [vmem:[%s1755_s4 + $0xd0] sm:$0xff] }
  0x18   : > { %390 = vmatpush.bf16.msra.mxu0 %v1402_v15  ;;  %v475_v41 = vsel %vm457_vm0, %v1574_v21, %v456_v26  ;;  %v488_v42 = vrot.slane %v486_v36, 6  ;;  %v502_v43 = vshll.u32 %v465_v30, 16  ;;  %v512_v44 = vshrl.u32 %v470_v33, 16  ;;  %v1418_v30 = vld [vmem:[%s1755_s4 + $0xa0] sm:$0xff]  ;;  %v322_v36 = vld [vmem:[%s299_s20 + $0xc] sm:$0x7] }
  0x19   : > { %592 = vmatpush.bf16.msra.mxu2 %v1406_v17  ;;  %v473_v46 = vrot.slane %v471_v35, 2  ;;  %v491_v47 = vrot.slane %v489_v39, 7  ;;  %v501_v48 = vrot.slane %v499_v40, 6  ;;  %v515_v49 = vshll.u32 %v470_v33, 16  ;;  %v320_v33 = vld [vmem:[%s299_s20 + $0x4] sm:$0x7] }
  0x1a   : > { %442 = vmatpush.bf16.msra.mxu1 %v1398_v27  ;;  %v355_v50 = vld.sshfl [vmem:[#allocation1] sm:$0xff pattern:$0x73625140]  ;;  %v478_v51 = vrot.slane %v476_v38, 2  ;;  %v504_v53 = vrot.slane %v502_v43, 7  ;;  %v514_v54 = vrot.slane %v512_v44, 6 }
  0x1b   : > { %655 = vmatpush.bf16.msra.mxu3 %v1410_v32  ;;  %1203 = vmatmul.msk.bf16.vlgmr.msra.gmra.mxu0 %vm380_vm2, %v355_v50  ;;  %398 = vst [vmem:[#allocation1] ss:$4 sm:$0xff] %v309_v18  ;;  %v492_v55 = vor.u32 %v491_v47, %v488_v42  ;;  %v495_v56 = vshll.u32 %v463_v34, 16  ;;  %v517_v57 = vrot.slane %v515_v49, 7  ;;  %v525_v58 = vshrl.u32 %v475_v41, 16 }
  0x1c   : > { %715 = vmatpush.bf16.msrb.mxu0 %v1417_v24  ;;  %401 = vst [vmem:[#allocation1 + $0x1] ss:$4 sm:$0xff] %v1567_v19  ;;  %v505_v59 = vor.u32 %v504_v53, %v501_v48  ;;  %v508_v60 = vshll.u32 %v468_v37, 16  ;;  %v528_v61 = vshll.u32 %v475_v41, 16  ;;  %vm484_vm8 = vsmask.f32 7448 }
  0x1d   : > { %404 = vst [vmem:[#allocation1 + $0x2] ss:$4 sm:$0xff] %v1570_v20  ;;  %v518_v0 = vor.u32 %v517_v57, %v514_v54  ;;  %v521_v1 = vshll.u32 %v473_v46, 16  ;;  %v527_v2 = vrot.slane %v525_v58, 6  ;;  %v534_v4 = vshll.u32 %v478_v51, 16  ;;  %vm1628_vm9 = vmor %vm483_vm7, %vm484_vm8  ;;  %918 = vmatpush.bf16.msrb.mxu2 %v1425_v29  ;;  %v1423_v46 = vld [vmem:[%s1755_s4 + $0xc8] sm:$0xff] }
  0x1e   : > { %407 = vst [vmem:[#allocation1 + $0x3] ss:$4 sm:$0xff] %v1574_v21  ;;  %v530_v3 = vrot.slane %v528_v61, 7  ;;  %858 = vmatpush.bf16.msrb.mxu1 %v1421_v63  ;;  %v493_v6 = vrot.slane %v492_v55, 2  ;;  %v497_v7 = vrot.slane %v495_v56, 7  ;;  %v506_v9 = vrot.slane %v505_v59, 2 }
  0x1f   : > { %v510_v10 = vrot.slane %v508_v60, 7  ;;  %v519_v15 = vrot.slane %v518_v0, 2  ;;  %v523_v17 = vrot.slane %v521_v1, 7  ;;  %v536_v22 = vrot.slane %v534_v4, 7  ;;  %v319_v32 = vld [vmem:[%s299_s20] sm:$0x7] }
  0x20   : > { %716 = vmatpush.bf16.msrb.mxu0 %v1416_v45  ;;  %v531_v11 = vor.u32 %v530_v3, %v527_v2  ;;  %v498_v23 = vsel %vm1628_vm9, %v493_v6, %v497_v7  ;;  %v731_v34 = vrot.slane %v319_v32, 2  ;;  %v321_v35 = vld [vmem:[%s299_s20 + $0x8] sm:$0x7]  ;;  %v732_v37 = vrot.slane %v320_v33, 2  ;;  %v1429_v45 = vld [vmem:[%s1755_s4 + $0xf8] sm:$0xff]  ;;  %v1428_v53 = vld [vmem:[%s1755_s4 + $0xf0] sm:$0xff] }
  0x21   : > { %v1639_v24 = vsel %vm1628_vm9, %v506_v9, %v510_v10  ;;  %v1643_v26 = vsel %vm1628_vm9, %v519_v15, %v523_v17  ;;  %919 = vmatpush.bf16.msrb.mxu2 %v1424_v31  ;;  %v733_v38 = vrot.slane %v321_v35, 2  ;;  %v734_v39 = vrot.slane %v322_v36, 2  ;;  %978 = vmatpush.bf16.msrb.mxu3 %v1429_v45  ;;  %v1422_v54 = vld [vmem:[%s1755_s4 + $0xc0] sm:$0xff]  ;;  %v325_v3 = vld [vmem:[%s304_s30 + $0x8] sm:$0x7] }
  0x22   : > { %v532_v18 = vrot.slane %v531_v11, 2  ;;  %859 = vmatpush.bf16.msrb.mxu1 %v1420_v5  ;;  %v736_v41 = vsel %vm457_vm0, %v319_v32, %v731_v34  ;;  %v741_v42 = vsel %vm457_vm0, %v320_v33, %v732_v37  ;;  %v737_v49 = vsel %vm460_vm1, %v319_v32, %v731_v34  ;;  %v323_v59 = vld [vmem:[%s304_s30] sm:$0x7]  ;;  %v326_v7 = vld [vmem:[%s304_s30 + $0xc] sm:$0x7] }
  0x23   : > { %v746_v43 = vsel %vm457_vm0, %v321_v35, %v733_v38  ;;  %v751_v44 = vsel %vm457_vm0, %v322_v36, %v734_v39  ;;  %v755_v47 = vshrl.u32 %v736_v41, 16  ;;  %v758_v48 = vshll.u32 %v736_v41, 16 }
  0x24   : > { %717 = vmatpush.bf16.msrb.mxu0 %v1415_v62  ;;  %v1647_v27 = vsel %vm1628_vm9, %v532_v18, %v536_v22  ;;  %v742_v50 = vsel %vm460_vm1, %v320_v33, %v732_v37  ;;  %v768_v51 = vshrl.u32 %v741_v42, 16  ;;  %v771_v52 = vshll.u32 %v741_v42, 16  ;;  %v324_v62 = vld [vmem:[%s304_s30 + $0x4] sm:$0x7]  ;;  %v313_v18 = vld [vmem:[%s1546_s7 + $0x10] sm:$0x7] }
  0x25   : > { %v408_v25 = vld.sshfl [vmem:[#allocation1] sm:$0xff pattern:$0x73625140]  ;;  %920 = vmatpush.bf16.msrb.mxu2 %v1423_v46  ;;  %v747_v55 = vsel %vm460_vm1, %v321_v35, %v733_v38  ;;  %v781_v56 = vshrl.u32 %v746_v43, 16  ;;  %v784_v57 = vshll.u32 %v746_v43, 16  ;;  %v794_v58 = vshrl.u32 %v751_v44, 16  ;;  %979 = vmatpush.bf16.msrb.mxu3 %v1428_v53 }
  0x26   : > { %548 = vst [vmem:[#allocation1] ss:$4 sm:$0xff] %v498_v23  ;;  %1220 = vmatmul.msk.bf16.vlgmr.msra.gmra.mxu1 %vm380_vm2, %v408_v25  ;;  %v752_v60 = vsel %vm460_vm1, %v322_v36, %v734_v39  ;;  %v797_v61 = vshll.u32 %v751_v44, 16  ;;  %v739_v63 = vrot.slane %v737_v49, 2  ;;  %v744_v0 = vrot.slane %v742_v50, 2  ;;  %v1426_v42 = vld [vmem:[%s1755_s4 + $0xe0] sm:$0xff] }
  0x27   : > { %551 = vst [vmem:[#allocation1 + $0x1] ss:$4 sm:$0xff] %v1639_v24  ;;  %860 = vmatpush.bf16.msrb.mxu1 %v1419_v28  ;;  %v757_v1 = vrot.slane %v755_v47, 6  ;;  %v760_v2 = vrot.slane %v758_v48, 7  ;;  %v749_v4 = vrot.slane %v747_v55, 2  ;;  %v770_v5 = vrot.slane %v768_v51, 6 }
  0x28   : > { %718 = vmatpush.bf16.msrb.mxu0 %v1414_v12  ;;  %554 = vst [vmem:[#allocation1 + $0x2] ss:$4 sm:$0xff] %v1643_v26  ;;  %v773_v6 = vrot.slane %v771_v52, 7  ;;  %v754_v9 = vrot.slane %v752_v60, 2  ;;  %v783_v10 = vrot.slane %v781_v56, 6  ;;  %v786_v11 = vrot.slane %v784_v57, 7 }
  0x29   : > { %557 = vst [vmem:[#allocation1 + $0x3] ss:$4 sm:$0xff] %v1647_v27  ;;  %921 = vmatpush.bf16.msrb.mxu2 %v1422_v54  ;;  %v796_v12 = vrot.slane %v794_v58, 6  ;;  %v799_v17 = vrot.slane %v797_v61, 7  ;;  %v761_v22 = vor.u32 %v760_v2, %v757_v1  ;;  %v764_v23 = vshll.u32 %v739_v63, 16  ;;  %v1432_v43 = vld [vmem:[%s1755_s4 + $0x110] sm:$0xff] }
  0x2a   : > { %v777_v25 = vshll.u32 %v744_v0, 16  ;;  %v991_v28 = vrot.slane %v313_v18, 2  ;;  %v774_v29 = vor.u32 %v773_v6, %v770_v5  ;;  %v790_v31 = vshll.u32 %v749_v4, 16  ;;  %v1431_v63 = vld [vmem:[%s1755_s4 + $0x108] sm:$0xff]  ;;  %v1430_v0 = vld [vmem:[%s1755_s4 + $0x100] sm:$0xff] }
  0x2b   : > { %861 = vmatpush.bf16.msrb.mxu1 %v1418_v30  ;;  %v787_v30 = vor.u32 %v786_v11, %v783_v10  ;;  %v762_v39 = vrot.slane %v761_v22, 2  ;;  %v318_v2 = vld [vmem:[%s1534_s24 + $0x10] sm:$0x7] }
  0x2c   : > { %v993_v34 = vsel %vm457_vm0, %v313_v18, %v991_v28  ;;  %v779_v41 = vrot.slane %v777_v25, 7  ;;  %v994_v44 = vsel %vm460_vm1, %v313_v18, %v991_v28  ;;  %v775_v45 = vrot.slane %v774_v29, 2 }
  0x2d   : > { %v997_v37 = vshrl.u32 %v993_v34, 16  ;;  %v1000_v38 = vshll.u32 %v993_v34, 16  ;;  %v996_v46 = vrot.slane %v994_v44, 2  ;;  %v788_v49 = vrot.slane %v787_v30, 2 }
  0x2e   : > { %v792_v50 = vrot.slane %v790_v31, 7  ;;  %v780_v56 = vsel %vm1628_vm9, %v775_v45, %v779_v41 }
  0x2f   : > { %v999_v47 = vrot.slane %v997_v37, 6  ;;  %v1002_v48 = vrot.slane %v1000_v38, 7  ;;  %v1006_v54 = vshll.u32 %v996_v46, 16  ;;  %v1443_v37 = vld [vmem:[%s1756_s5] ss:$0 sm:$0xff] }
  0x30   : > { %v558_v40 = vld.sshfl [vmem:[#allocation1] sm:$0xff pattern:$0x73625140]  ;;  %v793_v60 = vsel %vm1628_vm9, %v788_v49, %v792_v50 }
  0x31   : > { %1245 = vmatmul.msk.bf16.vlgmr.msra.gmra.mxu2 %vm380_vm2, %v558_v40  ;;  %611 = vst [vmem:[#allocation1] ss:$4 sm:$0xff] %v319_v32  ;;  %v1427_v32 = vld [vmem:[%s1755_s4 + $0xe8] sm:$0xff]  ;;  %v766_v40 = vrot.slane %v764_v23, 7  ;;  %v1003_v53 = vor.u32 %v1002_v48, %v999_v47  ;;  %v1008_v58 = vrot.slane %v1006_v54, 7 }
  0x32   : > { %614 = vst [vmem:[#allocation1 + $0x1] ss:$4 sm:$0xff] %v320_v33  ;;  %v1433_v33 = vld [vmem:[%s1755_s4 + $0x118] sm:$0xff]  ;;  %980 = vmatpush.bf16.msrb.mxu3 %v1427_v32 }
  0x33   : > { %617 = vst [vmem:[#allocation1 + $0x2] ss:$4 sm:$0xff] %v321_v35  ;;  %v800_v35 = vor.u32 %v799_v17, %v796_v12  ;;  %1058 = vmatpush.bf16.msra.mxu0 %v1433_v33  ;;  %v767_v55 = vsel %vm1628_vm9, %v762_v39, %v766_v40  ;;  %v1004_v57 = vrot.slane %v1003_v53, 2 }
  0x34   : > { %620 = vst [vmem:[#allocation1 + $0x3] ss:$4 sm:$0xff] %v322_v36  ;;  %v803_v36 = vshll.u32 %v754_v9, 16 }
  0x35   : > { %v801_v51 = vrot.slane %v800_v35, 2 }
  0x36   : > { %v805_v52 = vrot.slane %v803_v36, 7  ;;  %981 = vmatpush.bf16.msrb.mxu3 %v1426_v42 }
  0x37   : > { %1059 = vmatpush.bf16.msra.mxu0 %v1432_v43 }
  0x38   : > { %v806_v61 = vsel %vm1628_vm9, %v801_v51, %v805_v52 }
  0x3b   : > { %v621_v15 = vld.sshfl [vmem:[#allocation1] sm:$0xff pattern:$0x73625140]  ;;  %1060 = vmatpush.bf16.msra.mxu0 %v1431_v63 }
  0x3c   : > { %1270 = vmatmul.msk.bf16.vlgmr.msra.gmra.mxu3 %vm380_vm2, %v621_v15  ;;  %674 = vst [vmem:[#allocation1] ss:$4 sm:$0xff] %v323_v59 }
  0x3d   : > { %677 = vst [vmem:[#allocation1 + $0x1] ss:$4 sm:$0xff] %v324_v62  ;;  %v1009_v62 = vsel %vm1628_vm9, %v1004_v57, %v1008_v58 }
  0x3e   : > { %680 = vst [vmem:[#allocation1 + $0x2] ss:$4 sm:$0xff] %v325_v3 }
  0x3f   : > { %683 = vst [vmem:[#allocation1 + $0x3] ss:$4 sm:$0xff] %v326_v7  ;;  %1061 = vmatpush.bf16.msra.mxu0 %v1430_v0 }
  0x46   : > { %v684_v59 = vld.sshfl [vmem:[#allocation1] sm:$0xff pattern:$0x73625140] }
  0x47   : > { %1295 = vmatmul.msk.bf16.vlgmr.msrb.gmra.mxu0 %vm380_vm2, %v684_v59  ;;  %817 = vst [vmem:[#allocation1] ss:$4 sm:$0xff] %v767_v55 }
  0x48   : > { %820 = vst [vmem:[#allocation1 + $0x1] ss:$4 sm:$0xff] %v780_v56 }
  0x49   : > { %823 = vst [vmem:[#allocation1 + $0x2] ss:$4 sm:$0xff] %v793_v60 }
  0x4a   : > { %826 = vst [vmem:[#allocation1 + $0x3] ss:$4 sm:$0xff] %v806_v61 }
  0x51   : > { %v827_v1 = vld.sshfl [vmem:[#allocation1] sm:$0xff pattern:$0x73625140] }
  0x52   : > { %1320 = vmatmul.msk.bf16.vlgmr.msrb.gmra.mxu1 %vm380_vm2, %v827_v1  ;;  %879 = vst [vmem:[#allocation1] ss:$4 sm:$0xff] %v1567_v19 }
  0x53   : > { %881 = vst [vmem:[#allocation1 + $0x1] ss:$4 sm:$0xff] %v1570_v20 }
  0x54   : > { %883 = vst [vmem:[#allocation1 + $0x2] ss:$4 sm:$0xff] %v1574_v21 }
  0x55   : > { %886 = vst [vmem:[#allocation1 + $0x3] ss:$4 sm:$0xff] %v313_v18 }
  0x5c   : > { %v887_v8 = vld.sshfl [vmem:[#allocation1] sm:$0xff pattern:$0x73625140] }
  0x5d   : > { %1345 = vmatmul.msk.bf16.vlgmr.msrb.gmra.mxu2 %vm380_vm2, %v887_v8  ;;  %939 = vst [vmem:[#allocation1] ss:$4 sm:$0xff] %v1550_v13 }
  0x5e   : > { %941 = vst [vmem:[#allocation1 + $0x1] ss:$4 sm:$0xff] %v1553_v14 }
  0x5f   : > { %943 = vst [vmem:[#allocation1 + $0x2] ss:$4 sm:$0xff] %v1559_v16 }
  0x60   : > { %946 = vst [vmem:[#allocation1 + $0x3] ss:$4 sm:$0xff] %v318_v2 }
  0x67   : > { %v947_v3 = vld.sshfl [vmem:[#allocation1] sm:$0xff pattern:$0x73625140] }
  0x68   : > { %1370 = vmatmul.msk.bf16.vlgmr.msrb.gmra.mxu3 %vm380_vm2, %v947_v3  ;;  %1019 = vst [vmem:[#allocation1] ss:$4 sm:$0xff] %v1639_v24 }
  0x69   : > { %1021 = vst [vmem:[#allocation1 + $0x1] ss:$4 sm:$0xff] %v1643_v26 }
  0x6a   : > { %1023 = vst [vmem:[#allocation1 + $0x2] ss:$4 sm:$0xff] %v1647_v27 }
  0x6b   : > { %1026 = vst [vmem:[#allocation1 + $0x3] ss:$4 sm:$0xff] %v1009_v62 }
  0x72   : > { %v1027_v19 = vld.sshfl [vmem:[#allocation1] sm:$0xff pattern:$0x73625140] }
  0x73   : > { %1395 = vmatmul.msk.bf16.vlgmr.msra.gmra.mxu0 %vm380_vm2, %v1027_v19 }
  0x98   : > { %v392_v13 = vpop.f32.mrf.mxu0 }
  0xa0   : > { %v394_v21 = vpop.f32.mrf.mxu0 }
  0xa3   : > { %v444_v20 = vpop.f32.mrf.mxu1 }
  0xa4   : > { %v445_v5 = vadd.f32 %v444_v20, %v392_v13 }
  0xab   : > { %v446_v16 = vpop.f32.mrf.mxu1 }
  0xac   : > { %v447_v26 = vadd.f32 %v446_v16, %v394_v21 }
  0xb4   : > { %v594_v14 = vpop.f32.mrf.mxu2 }
  0xb5   : > { %v599_v9 = vadd.f32 %v594_v14, %v445_v5 }
  0xbc   : > { %v596_v7 = vpop.f32.mrf.mxu2 }
  0xbd   : > { %v600_v17 = vadd.f32 %v596_v7, %v447_v26 }
  0xbf   : > { %v657_v4 = vpop.f32.mrf.mxu3 }
  0xc0   : > { %v662_v11 = vadd.f32 %v657_v4, %v599_v9 }
  0xc4   : > { %v720_v6 = vpop.f32.mrf.mxu0 }
  0xc5   : > { %v725_v15 = vadd.f32 %v720_v6, %v662_v11 }
  0xc7   : > { %v659_v10 = vpop.f32.mrf.mxu3 }
  0xc8   : > { %v663_v18 = vadd.f32 %v659_v10, %v600_v17 }
  0xcc   : > { %v722_v27 = vpop.f32.mrf.mxu0 }
  0xcd   : > { %v726_v28 = vadd.f32 %v722_v27, %v663_v18 }
  0xcf   : > { %v863_v24 = vpop.f32.mrf.mxu1 }
  0xd0   : > { %v868_v23 = vadd.f32 %v863_v24, %v725_v15 }
  0xd7   : > { %v865_v25 = vpop.f32.mrf.mxu1 }
  0xd8   : > { %v869_v32 = vadd.f32 %v865_v25, %v726_v28 }
  0xe0   : > { %v923_v12 = vpop.f32.mrf.mxu2 }
  0xe1   : > { %v928_v29 = vadd.f32 %v923_v12, %v868_v23 }
  0xe8   : > { %v925_v30 = vpop.f32.mrf.mxu2 }
  0xe9   : > { %v929_v34 = vadd.f32 %v925_v30, %v869_v32 }
  0xeb   : > { %v983_v22 = vpop.f32.mrf.mxu3 }
  0xec   : > { %v988_v33 = vadd.f32 %v983_v22, %v928_v29 }
  0xf0   : > { %v1063_v31 = vpop.f32.mrf.mxu0 }
  0xf1   : > { %v1068_v36 = vadd.f32 %v1063_v31, %v988_v33 }
  0xf3   : > { %v985_v35 = vpop.f32.mrf.mxu3  ;;  %v1074_v40 = vadd.f32 %v1443_v37, %v1068_v36 }
  0xf4   : > { %v989_v38 = vadd.f32 %v985_v35, %v929_v34 }
  0xf5   : > { %v1076_v43 = vmax.f32 %v1074_v40, 0.0 }
  0xf8   : > { %v1065_v39 = vpop.f32.mrf.mxu0 }
  0xf9   : > { %v1069_v41 = vadd.f32 %v1065_v39, %v989_v38 }
  0xfb   : > { %v1075_v42 = vadd.f32 %v1443_v37, %v1069_v41 }
  0xfd   : > { %v1077_v44 = vmax.f32 %v1075_v42, 0.0 }
  0xff   : > { %v1078_v45 = vadd.f32 %v1077_v44, %v1076_v43 }
 0x101   : > { %v1079_v46 = vrot.slane %v1078_v45, 4 }
 0x103   : > { %v1080_v47 = vadd.f32 %v1079_v46, %v1078_v45 }
 0x105   : > { %v1081_v48 = vrot.slane %v1080_v47, 2 }
 0x107   : > { %v1082_v49 = vadd.f32 %v1081_v48, %v1080_v47 }
 0x109   : > { %v1083_v50 = vrot.slane %v1082_v49, 1 }
 0x10b   : > { %v1084_v51 = vadd.f32 %v1083_v50, %v1082_v49 }
 0x10d   : > { %v1085_v52 = vmul.f32 0.0625, %v1084_v51 }
 0x10f   : > { %1086 = vst [vmem:[%s307_s29] sm:$0x1] %v1085_v52 }
 0x110 PF: > { %s16_s21 = sadd.s32 1, %s1450_s21  }
 0x111   : > { %p13_p4 = scmp.ge.s32.totalorder %s16_s21, 4  }
 0x113   :  { %15 = sbr.rel (!%p13_p4) target bundleno = 1 (0x1), region = 118 }

</bundles_post_ra>
